<compile_context>
chip_gen: v6e
topology: v6e:2x2x1
jax: 0.10.0
libtpu: 0.0.40
codegen_flags: <defaults>
</compile_context>

<pallas_src>
import functools

import jax
import jax.numpy as jnp
from jax import lax
from jax.experimental import pallas as pl
from jax.experimental.pallas import tpu as pltpu


# ----------------------------------------------------------------------------
# helpers
# ----------------------------------------------------------------------------
def _round_up(x, m):
    return (x + m - 1) // m * m


def _pick_time_chunk(T, max_chunk=16):
    tc = min(T, max_chunk)
    while T % tc:
        tc -= 1
    return tc


def _pad_gate_rows(w, H, Hp):
    """(4H, ...) gate-stacked [i,f,g,o] -> (4Hp, ...), zero-padding each gate block."""
    if Hp == H:
        return w
    tail = w.shape[1:]
    w4 = w.reshape((4, H) + tail)
    pad = [(0, 0), (0, Hp - H)] + [(0, 0)] * len(tail)
    return jnp.pad(w4, pad).reshape((4 * Hp,) + tail)


# ----------------------------------------------------------------------------
# Pallas kernel: recurrent part of one LSTM layer.
# Grid iterates over time chunks (sequential); h/c persist in VMEM scratch.
# ----------------------------------------------------------------------------
def _lstm_recurrent_kernel(gx_ref, whh_ref,             # in : (Tc,Bp,4Hp) f32, (Hp,4Hp) bf16
                           out_ref, hn_ref, cn_ref,     # out: (Tc,Bp,Hp), (Bp,Hp), (Bp,Hp)
                           h_scr, c_scr,                # scratch: (Bp,Hp) f32 x2
                           *, hidden_p, t_chunk):
    chunk = pl.program_id(0)

    @pl.when(chunk == 0)
    def _():
        h_scr[...] = jnp.zeros_like(h_scr)
        c_scr[...] = jnp.zeros_like(c_scr)

    Hp = hidden_p
    whh = whh_ref[...]                                   # resident bf16 weight

    def step(i, carry):
        h_prev, c_prev = carry                           # (Bp, Hp) f32
        gates = gx_ref[i] + jnp.dot(h_prev.astype(jnp.bfloat16), whh,
                                    preferred_element_type=jnp.float32)
        if_sig = jax.nn.sigmoid(gates[:, 0:2 * Hp])      # fused i,f sigmoid (contiguous slab)
        i_g = if_sig[:, 0:Hp]
        f_g = if_sig[:, Hp:2 * Hp]
        g_g = jnp.tanh(gates[:, 2 * Hp:3 * Hp])
        o_g = jax.nn.sigmoid(gates[:, 3 * Hp:4 * Hp])
        c_new = f_g * c_prev + i_g * g_g
        h_new = o_g * jnp.tanh(c_new)
        out_ref[i] = h_new
        return h_new, c_new

    h_fin, c_fin = lax.fori_loop(0, t_chunk, step, (h_scr[...], c_scr[...]),
                                 unroll=True)
    h_scr[...] = h_fin
    c_scr[...] = c_fin

    @pl.when(chunk == pl.num_programs(0) - 1)
    def _():
        hn_ref[...] = h_fin
        cn_ref[...] = c_fin


def lstm_layer_pallas(x_tbe, w_ih, w_hh, b_ih, b_hh, hidden_dim):
    """One LSTM layer on time-major, batch-padded input.

    x_tbe: (T, Bp, in_dim) f32   (in_dim = E for layer 0, Hp for later layers)
    w_ih: (4H, E or H); w_hh: (4H, H); b_*: (4H,)
    Returns out (T, Bp, Hp), h_n (Bp, Hp), c_n (Bp, Hp); padded hidden columns are exactly 0.
    """
    T, Bp, in_dim = x_tbe.shape
    H = hidden_dim
    Hp = _round_up(H, 128)

    # --- pad parameters per-gate so every gate slice is lane (128) aligned ----------------
    w_ih_p = _pad_gate_rows(w_ih, H, Hp)                             # (4Hp, w_ih cols)
    if w_ih_p.shape[1] != in_dim:                                    # layer>0 input is Hp-padded
        w_ih_p = jnp.pad(w_ih_p, ((0, 0), (0, in_dim - w_ih_p.shape[1])))
    w_hh_p = _pad_gate_rows(w_hh, H, Hp)                             # (4Hp, H)
    w_hh_p = jnp.pad(w_hh_p, ((0, 0), (0, Hp - H)))                  # (4Hp, Hp)
    bias_p = _pad_gate_rows(b_ih + b_hh, H, Hp)                      # (4Hp,)

    # --- hoisted input projection: one big bf16 matmul, f32 accumulation (parallel work) --
    x2d = x_tbe.reshape(T * Bp, in_dim).astype(jnp.bfloat16)
    gx = jnp.dot(x2d, jnp.transpose(w_ih_p).astype(jnp.bfloat16),
                 preferred_element_type=jnp.float32) + bias_p[None, :]
    gx = gx.reshape(T, Bp, 4 * Hp)                                   # f32 gate pre-activations

    whh_t = jnp.transpose(w_hh_p).astype(jnp.bfloat16)               # (Hp, 4Hp)

    Tc = _pick_time_chunk(T)
    kernel = functools.partial(_lstm_recurrent_kernel, hidden_p=Hp, t_chunk=Tc)

    out, h_n, c_n = pl.pallas_call(
        kernel,
        out_shape=(jax.ShapeDtypeStruct((T, Bp, Hp), jnp.float32),
                   jax.ShapeDtypeStruct((Bp, Hp), jnp.float32),
                   jax.ShapeDtypeStruct((Bp, Hp), jnp.float32)),
        grid_spec=pltpu.PrefetchScalarGridSpec(
            num_scalar_prefetch=0,
            grid=(T // Tc,),
            in_specs=[
                pl.BlockSpec((Tc, Bp, 4 * Hp), lambda c: (c, 0, 0)),   # precomputed x-gates
                pl.BlockSpec((Hp, 4 * Hp), lambda c: (0, 0)),          # W_hh^T (bf16, resident)
            ],
            out_specs=[
                pl.BlockSpec((Tc, Bp, Hp), lambda c: (c, 0, 0)),       # hidden sequence
                pl.BlockSpec((Bp, Hp), lambda c: (0, 0)),              # final h
                pl.BlockSpec((Bp, Hp), lambda c: (0, 0)),              # final c
            ],
            scratch_shapes=[pltpu.VMEM((Bp, Hp), jnp.float32),         # h carry
                            pltpu.VMEM((Bp, Hp), jnp.float32)]),       # c carry
        compiler_params=pltpu.CompilerParams(
            dimension_semantics=("arbitrary",),                        # sequential recurrence
            vmem_limit_bytes=48 * 1024 * 1024),
    )(gx, whh_t)
    return out, h_n, c_n


# ----------------------------------------------------------------------------
# EncoderLSTM forward: embedding lookup (frozen table, XLA gather) + stacked LSTM.
# ----------------------------------------------------------------------------
def encoder_lstm_forward(token_ids, embedding_weights, lstm_params, hidden_dim):
    B, T = token_ids.shape
    Bp = _round_up(B, 8)

    # Gather directly in time-major order (T, B, E): folds the transpose into the gather.
    x = jnp.take(embedding_weights, jnp.transpose(token_ids), axis=0)
    if Bp != B:
        x = jnp.pad(x, ((0, 0), (0, Bp - B), (0, 0)))

    h_list, c_list = [], []
    for (w_ih, w_hh, b_ih, b_hh) in lstm_params:
        x, h_n, c_n = lstm_layer_pallas(x, w_ih, w_hh, b_ih, b_hh, hidden_dim)
        h_list.append(h_n[:B, :hidden_dim])
        c_list.append(c_n[:B, :hidden_dim])
        # nn.LSTM inter-layer dropout(0.2) is train-only -> identity at inference.

    output = jnp.transpose(x[:, :B, :hidden_dim], (1, 0, 2))      # (B, T, H) batch_first
    h_n = jnp.stack(h_list, axis=0)                               # (n_layers, B, H)
    c_n = jnp.stack(c_list, axis=0)                               # (n_layers, B, H)
    return output, (h_n, c_n)


# ----------------------------------------------------------------------------
# Deterministic parameter init (torch.nn.LSTM shapes, U(-1/sqrt(H), 1/sqrt(H))).
# ----------------------------------------------------------------------------
def init_lstm_params(key, embed_dim, hidden_dim, n_layers):
    params = []
    bound = 1.0 / float(hidden_dim) ** 0.5
    for layer in range(n_layers):
        in_dim = embed_dim if layer == 0 else hidden_dim
        key, k1, k2, k3, k4 = jax.random.split(key, 5)
        w_ih = jax.random.uniform(k1, (4 * hidden_dim, in_dim),
                                  minval=-bound, maxval=bound, dtype=jnp.float32)
        w_hh = jax.random.uniform(k2, (4 * hidden_dim, hidden_dim),
                                  minval=-bound, maxval=bound, dtype=jnp.float32)
        b_ih = jax.random.uniform(k3, (4 * hidden_dim,),
                                  minval=-bound, maxval=bound, dtype=jnp.float32)
        b_hh = jax.random.uniform(k4, (4 * hidden_dim,),
                                  minval=-bound, maxval=bound, dtype=jnp.float32)
        params.append((w_ih, w_hh, b_ih, b_hh))
    return params


# ----------------------------------------------------------------------------
# Pure-JAX f32 reference (same math as torch.nn.LSTM inference).
# ----------------------------------------------------------------------------
def reference_forward(token_ids, embedding_weights, lstm_params, hidden_dim):
    emb = jnp.take(embedding_weights, token_ids, axis=0)    # (B, T, E)
    B, T, _ = emb.shape
    x = emb
    h_all, c_all = [], []
    for (w_ih, w_hh, b_ih, b_hh) in lstm_params:
        h = jnp.zeros((B, hidden_dim), jnp.float32)
        c = jnp.zeros((B, hidden_dim), jnp.float32)
        outs = []
        for t in range(T):
            g = x[:, t, :] @ w_ih.T + h @ w_hh.T + b_ih + b_hh
            i_g = jax.nn.sigmoid(g[:, 0 * hidden_dim:1 * hidden_dim])
            f_g = jax.nn.sigmoid(g[:, 1 * hidden_dim:2 * hidden_dim])
            g_g = jnp.tanh(g[:, 2 * hidden_dim:3 * hidden_dim])
            o_g = jax.nn.sigmoid(g[:, 3 * hidden_dim:4 * hidden_dim])
            c = f_g * c + i_g * g_g
            h = o_g * jnp.tanh(c)
            outs.append(h)
        x = jnp.stack(outs, axis=1)
        h_all.append(h)
        c_all.append(c)
    return x, (jnp.stack(h_all, 0), jnp.stack(c_all, 0))


if __name__ == "__main__":
    vocab_size, embed_dim, hidden_dim, n_layers = 16, 32, 32, 2
    batch, seq = 2, 8

    key = jax.random.PRNGKey(0)
    key, k_emb, k_tok, k_params = jax.random.split(key, 4)

    embedding_weights = jax.random.normal(k_emb, (vocab_size, embed_dim), dtype=jnp.float32)
    token_ids = jax.random.randint(k_tok, (batch, seq), 0, vocab_size, dtype=jnp.int32)
    lstm_params = init_lstm_params(k_params, embed_dim, hidden_dim, n_layers)

    fwd = jax.jit(encoder_lstm_forward, static_argnums=(3,))
    output, (h_n, c_n) = fwd(token_ids, embedding_weights, lstm_params, hidden_dim)
    jax.block_until_ready((output, h_n, c_n))

    ref_out, (ref_h, ref_c) = reference_forward(token_ids, embedding_weights,
                                                lstm_params, hidden_dim)

    assert output.shape == (batch, seq, hidden_dim)
    assert h_n.shape == (n_layers, batch, hidden_dim)
    assert c_n.shape == (n_layers, batch, hidden_dim)
    # Tolerance sized for bf16 matmul operands (f32 accumulation) vs. the pure-f32 reference.
    tol = 2e-2
    assert float(jnp.max(jnp.abs(output - ref_out))) < tol
    assert float(jnp.max(jnp.abs(h_n - ref_h))) < tol
    assert float(jnp.max(jnp.abs(c_n - ref_c))) < tol

    print("KERNEL_OK")
</pallas_src>

<mosaic_0001>
module attributes {stable_mosaic.version = 11 : i64} {
  func.func @_lstm_recurrent_kernel(%arg0: i32, %arg1: memref<8x8x512xf32, #tpu.memory_space<vmem>>, %arg2: memref<128x512xbf16, #tpu.memory_space<vmem>>, %arg3: memref<8x8x128xf32, #tpu.memory_space<vmem>>, %arg4: memref<8x128xf32, #tpu.memory_space<vmem>>, %arg5: memref<8x128xf32, #tpu.memory_space<vmem>>, %arg6: memref<8x128xf32, #tpu.memory_space<vmem>>, %arg7: memref<8x128xf32, #tpu.memory_space<vmem>>) attributes {dimension_semantics = [#tpu.dimension_semantics<arbitrary>], iteration_bounds = array<i64: 1>, scalar_prefetch = 0 : i64, scratch_operands = 2 : i64, tpu.core_type = #tpu.core_type<tc>, window_params = [{transform_indices = @transform_0, window_bounds = array<i64: 8, 8, 512>}, {pipeline_mode = #tpu.pipeline_mode<synchronous>, transform_indices = @transform_1, window_bounds = array<i64: 128, 512>}, {transform_indices = @transform_2, window_bounds = array<i64: 8, 8, 128>}, {pipeline_mode = #tpu.pipeline_mode<synchronous>, transform_indices = @transform_3, window_bounds = array<i64: 8, 128>}, {pipeline_mode = #tpu.pipeline_mode<synchronous>, transform_indices = @transform_4, window_bounds = array<i64: 8, 128>}]} {
    %c0_i32 = arith.constant 0 : i32
    %0 = arith.cmpi eq, %arg0, %c0_i32 : i32
    %1 = arith.extui %0 : i1 to i32
    %c0_i32_0 = arith.constant 0 : i32
    %2 = arith.cmpi ne, %1, %c0_i32_0 : i32
    scf.if %2 {
      %cst_68 = arith.constant 0.000000e+00 : f32
      %259 = vector.broadcast %cst_68 : f32 to vector<8x128xf32>
      %c0_69 = arith.constant 0 : index
      %c0_70 = arith.constant 0 : index
      %260 = vector.load %arg6[%c0_69, %c0_70] : memref<8x128xf32, #tpu.memory_space<vmem>>, vector<8x128xf32>
      tpu.vector_store %arg6[%c0_69, %c0_70], %259 {strides = array<i32>} : memref<8x128xf32, #tpu.memory_space<vmem>>, vector<8x128xf32>,
      %cst_71 = arith.constant 0.000000e+00 : f32
      %261 = vector.broadcast %cst_71 : f32 to vector<8x128xf32>
      %c0_72 = arith.constant 0 : index
      %c0_73 = arith.constant 0 : index
      %262 = vector.load %arg7[%c0_72, %c0_73] : memref<8x128xf32, #tpu.memory_space<vmem>>, vector<8x128xf32>
      tpu.vector_store %arg7[%c0_72, %c0_73], %261 {strides = array<i32>} : memref<8x128xf32, #tpu.memory_space<vmem>>, vector<8x128xf32>,
    } else {
    }
    %c0 = arith.constant 0 : index
    %c0_1 = arith.constant 0 : index
    %3 = vector.load %arg2[%c0, %c0_1] : memref<128x512xbf16, #tpu.memory_space<vmem>>, vector<128x512xbf16>
    %c0_2 = arith.constant 0 : index
    %c0_3 = arith.constant 0 : index
    %4 = vector.load %arg6[%c0_2, %c0_3] : memref<8x128xf32, #tpu.memory_space<vmem>>, vector<8x128xf32>
    %c0_4 = arith.constant 0 : index
    %c0_5 = arith.constant 0 : index
    %5 = vector.load %arg7[%c0_4, %c0_5] : memref<8x128xf32, #tpu.memory_space<vmem>>, vector<8x128xf32>
    %c0_i32_6 = arith.constant 0 : i32
    %6 = arith.index_cast %c0_i32_6 : i32 to index
    %c0_7 = arith.constant 0 : index
    %c0_8 = arith.constant 0 : index
    %7 = vector.load %arg1[%6, %c0_7, %c0_8] : memref<8x8x512xf32, #tpu.memory_space<vmem>>, vector<1x8x512xf32>
    %8 = vector.shape_cast %7 : vector<1x8x512xf32> to vector<8x512xf32>
    %9 = arith.truncf %4 : vector<8x128xf32> to vector<8x128xbf16>
    %cst = arith.constant dense<0.000000e+00> : vector<8x512xf32>
    %10 = tpu.matmul %9, %3, %cst {dimension_numbers = #tpu.dot_dimension_numbers<[1], [0], [0], [1], [0, 0, 1, 1], [], []>} : vector<8x128xbf16>, vector<128x512xbf16>, vector<8x512xf32> -> vector<8x512xf32>
    %11 = arith.addf %8, %10 : vector<8x512xf32>
    %12 = vector.extract_strided_slice %11 {offsets = [0, 0], sizes = [8, 256], strides = [1, 1]} : vector<8x512xf32> to vector<8x256xf32>
    %13 = arith.negf %12 : vector<8x256xf32>
    %14 = math.exp %13 : vector<8x256xf32>
    %cst_9 = arith.constant 1.000000e+00 : f32
    %15 = vector.broadcast %cst_9 : f32 to vector<8x256xf32>
    %16 = arith.addf %15, %14 : vector<8x256xf32>
    %17 = arith.divf %15, %16 : vector<8x256xf32>
    %18 = vector.extract_strided_slice %17 {offsets = [0, 0], sizes = [8, 128], strides = [1, 1]} : vector<8x256xf32> to vector<8x128xf32>
    %19 = vector.extract_strided_slice %17 {offsets = [0, 128], sizes = [8, 128], strides = [1, 1]} : vector<8x256xf32> to vector<8x128xf32>
    %20 = vector.extract_strided_slice %11 {offsets = [0, 256], sizes = [8, 128], strides = [1, 1]} : vector<8x512xf32> to vector<8x128xf32>
    %21 = math.tanh %20 : vector<8x128xf32>
    %22 = vector.extract_strided_slice %11 {offsets = [0, 384], sizes = [8, 128], strides = [1, 1]} : vector<8x512xf32> to vector<8x128xf32>
    %23 = arith.negf %22 : vector<8x128xf32>
    %24 = math.exp %23 : vector<8x128xf32>
    %cst_10 = arith.constant 1.000000e+00 : f32
    %25 = vector.broadcast %cst_10 : f32 to vector<8x128xf32>
    %26 = arith.addf %25, %24 : vector<8x128xf32>
    %27 = arith.divf %25, %26 : vector<8x128xf32>
    %28 = arith.mulf %19, %5 : vector<8x128xf32>
    %29 = arith.mulf %18, %21 : vector<8x128xf32>
    %30 = arith.addf %28, %29 : vector<8x128xf32>
    %31 = math.tanh %30 : vector<8x128xf32>
    %32 = arith.mulf %27, %31 : vector<8x128xf32>
    %33 = arith.index_cast %c0_i32_6 : i32 to index
    %c0_11 = arith.constant 0 : index
    %c0_12 = arith.constant 0 : index
    %34 = vector.load %arg3[%33, %c0_11, %c0_12] : memref<8x8x128xf32, #tpu.memory_space<vmem>>, vector<1x8x128xf32>
    %35 = vector.shape_cast %34 : vector<1x8x128xf32> to vector<8x128xf32>
    %36 = vector.shape_cast %32 : vector<8x128xf32> to vector<1x8x128xf32>
    tpu.vector_store %arg3[%33, %c0_11, %c0_12], %36 {strides = array<i32>} : memref<8x8x128xf32, #tpu.memory_space<vmem>>, vector<1x8x128xf32>,
    %c1_i32 = arith.constant 1 : i32
    %37 = arith.index_cast %c1_i32 : i32 to index
    %c0_13 = arith.constant 0 : index
    %c0_14 = arith.constant 0 : index
    %38 = vector.load %arg1[%37, %c0_13, %c0_14] : memref<8x8x512xf32, #tpu.memory_space<vmem>>, vector<1x8x512xf32>
    %39 = vector.shape_cast %38 : vector<1x8x512xf32> to vector<8x512xf32>
    %40 = arith.truncf %32 : vector<8x128xf32> to vector<8x128xbf16>
    %cst_15 = arith.constant dense<0.000000e+00> : vector<8x512xf32>
    %41 = tpu.matmul %40, %3, %cst_15 {dimension_numbers = #tpu.dot_dimension_numbers<[1], [0], [0], [1], [0, 0, 1, 1], [], []>} : vector<8x128xbf16>, vector<128x512xbf16>, vector<8x512xf32> -> vector<8x512xf32>
    %42 = arith.addf %39, %41 : vector<8x512xf32>
    %43 = vector.extract_strided_slice %42 {offsets = [0, 0], sizes = [8, 256], strides = [1, 1]} : vector<8x512xf32> to vector<8x256xf32>
    %44 = arith.negf %43 : vector<8x256xf32>
    %45 = math.exp %44 : vector<8x256xf32>
    %cst_16 = arith.constant 1.000000e+00 : f32
    %46 = vector.broadcast %cst_16 : f32 to vector<8x256xf32>
    %47 = arith.addf %46, %45 : vector<8x256xf32>
    %48 = arith.divf %46, %47 : vector<8x256xf32>
    %49 = vector.extract_strided_slice %48 {offsets = [0, 0], sizes = [8, 128], strides = [1, 1]} : vector<8x256xf32> to vector<8x128xf32>
    %50 = vector.extract_strided_slice %48 {offsets = [0, 128], sizes = [8, 128], strides = [1, 1]} : vector<8x256xf32> to vector<8x128xf32>
    %51 = vector.extract_strided_slice %42 {offsets = [0, 256], sizes = [8, 128], strides = [1, 1]} : vector<8x512xf32> to vector<8x128xf32>
    %52 = math.tanh %51 : vector<8x128xf32>
    %53 = vector.extract_strided_slice %42 {offsets = [0, 384], sizes = [8, 128], strides = [1, 1]} : vector<8x512xf32> to vector<8x128xf32>
    %54 = arith.negf %53 : vector<8x128xf32>
    %55 = math.exp %54 : vector<8x128xf32>
    %cst_17 = arith.constant 1.000000e+00 : f32
    %56 = vector.broadcast %cst_17 : f32 to vector<8x128xf32>
    %57 = arith.addf %56, %55 : vector<8x128xf32>
    %58 = arith.divf %56, %57 : vector<8x128xf32>
    %59 = arith.mulf %50, %30 : vector<8x128xf32>
    %60 = arith.mulf %49, %52 : vector<8x128xf32>
    %61 = arith.addf %59, %60 : vector<8x128xf32>
    %62 = math.tanh %61 : vector<8x128xf32>
    %63 = arith.mulf %58, %62 : vector<8x128xf32>
    %64 = arith.index_cast %c1_i32 : i32 to index
    %c0_18 = arith.constant 0 : index
    %c0_19 = arith.constant 0 : index
    %65 = vector.load %arg3[%64, %c0_18, %c0_19] : memref<8x8x128xf32, #tpu.memory_space<vmem>>, vector<1x8x128xf32>
    %66 = vector.shape_cast %65 : vector<1x8x128xf32> to vector<8x128xf32>
    %67 = vector.shape_cast %63 : vector<8x128xf32> to vector<1x8x128xf32>
    tpu.vector_store %arg3[%64, %c0_18, %c0_19], %67 {strides = array<i32>} : memref<8x8x128xf32, #tpu.memory_space<vmem>>, vector<1x8x128xf32>,
    %c2_i32 = arith.constant 2 : i32
    %68 = arith.index_cast %c2_i32 : i32 to index
    %c0_20 = arith.constant 0 : index
    %c0_21 = arith.constant 0 : index
    %69 = vector.load %arg1[%68, %c0_20, %c0_21] : memref<8x8x512xf32, #tpu.memory_space<vmem>>, vector<1x8x512xf32>
    %70 = vector.shape_cast %69 : vector<1x8x512xf32> to vector<8x512xf32>
    %71 = arith.truncf %63 : vector<8x128xf32> to vector<8x128xbf16>
    %cst_22 = arith.constant dense<0.000000e+00> : vector<8x512xf32>
    %72 = tpu.matmul %71, %3, %cst_22 {dimension_numbers = #tpu.dot_dimension_numbers<[1], [0], [0], [1], [0, 0, 1, 1], [], []>} : vector<8x128xbf16>, vector<128x512xbf16>, vector<8x512xf32> -> vector<8x512xf32>
    %73 = arith.addf %70, %72 : vector<8x512xf32>
    %74 = vector.extract_strided_slice %73 {offsets = [0, 0], sizes = [8, 256], strides = [1, 1]} : vector<8x512xf32> to vector<8x256xf32>
    %75 = arith.negf %74 : vector<8x256xf32>
    %76 = math.exp %75 : vector<8x256xf32>
    %cst_23 = arith.constant 1.000000e+00 : f32
    %77 = vector.broadcast %cst_23 : f32 to vector<8x256xf32>
    %78 = arith.addf %77, %76 : vector<8x256xf32>
    %79 = arith.divf %77, %78 : vector<8x256xf32>
    %80 = vector.extract_strided_slice %79 {offsets = [0, 0], sizes = [8, 128], strides = [1, 1]} : vector<8x256xf32> to vector<8x128xf32>
    %81 = vector.extract_strided_slice %79 {offsets = [0, 128], sizes = [8, 128], strides = [1, 1]} : vector<8x256xf32> to vector<8x128xf32>
    %82 = vector.extract_strided_slice %73 {offsets = [0, 256], sizes = [8, 128], strides = [1, 1]} : vector<8x512xf32> to vector<8x128xf32>
    %83 = math.tanh %82 : vector<8x128xf32>
    %84 = vector.extract_strided_slice %73 {offsets = [0, 384], sizes = [8, 128], strides = [1, 1]} : vector<8x512xf32> to vector<8x128xf32>
    %85 = arith.negf %84 : vector<8x128xf32>
    %86 = math.exp %85 : vector<8x128xf32>
    %cst_24 = arith.constant 1.000000e+00 : f32
    %87 = vector.broadcast %cst_24 : f32 to vector<8x128xf32>
    %88 = arith.addf %87, %86 : vector<8x128xf32>
    %89 = arith.divf %87, %88 : vector<8x128xf32>
    %90 = arith.mulf %81, %61 : vector<8x128xf32>
    %91 = arith.mulf %80, %83 : vector<8x128xf32>
    %92 = arith.addf %90, %91 : vector<8x128xf32>
    %93 = math.tanh %92 : vector<8x128xf32>
    %94 = arith.mulf %89, %93 : vector<8x128xf32>
    %95 = arith.index_cast %c2_i32 : i32 to index
    %c0_25 = arith.constant 0 : index
    %c0_26 = arith.constant 0 : index
    %96 = vector.load %arg3[%95, %c0_25, %c0_26] : memref<8x8x128xf32, #tpu.memory_space<vmem>>, vector<1x8x128xf32>
    %97 = vector.shape_cast %96 : vector<1x8x128xf32> to vector<8x128xf32>
    %98 = vector.shape_cast %94 : vector<8x128xf32> to vector<1x8x128xf32>
    tpu.vector_store %arg3[%95, %c0_25, %c0_26], %98 {strides = array<i32>} : memref<8x8x128xf32, #tpu.memory_space<vmem>>, vector<1x8x128xf32>,
    %c3_i32 = arith.constant 3 : i32
    %99 = arith.index_cast %c3_i32 : i32 to index
    %c0_27 = arith.constant 0 : index
    %c0_28 = arith.constant 0 : index
    %100 = vector.load %arg1[%99, %c0_27, %c0_28] : memref<8x8x512xf32, #tpu.memory_space<vmem>>, vector<1x8x512xf32>
    %101 = vector.shape_cast %100 : vector<1x8x512xf32> to vector<8x512xf32>
    %102 = arith.truncf %94 : vector<8x128xf32> to vector<8x128xbf16>
    %cst_29 = arith.constant dense<0.000000e+00> : vector<8x512xf32>
    %103 = tpu.matmul %102, %3, %cst_29 {dimension_numbers = #tpu.dot_dimension_numbers<[1], [0], [0], [1], [0, 0, 1, 1], [], []>} : vector<8x128xbf16>, vector<128x512xbf16>, vector<8x512xf32> -> vector<8x512xf32>
    %104 = arith.addf %101, %103 : vector<8x512xf32>
    %105 = vector.extract_strided_slice %104 {offsets = [0, 0], sizes = [8, 256], strides = [1, 1]} : vector<8x512xf32> to vector<8x256xf32>
    %106 = arith.negf %105 : vector<8x256xf32>
    %107 = math.exp %106 : vector<8x256xf32>
    %cst_30 = arith.constant 1.000000e+00 : f32
    %108 = vector.broadcast %cst_30 : f32 to vector<8x256xf32>
    %109 = arith.addf %108, %107 : vector<8x256xf32>
    %110 = arith.divf %108, %109 : vector<8x256xf32>
    %111 = vector.extract_strided_slice %110 {offsets = [0, 0], sizes = [8, 128], strides = [1, 1]} : vector<8x256xf32> to vector<8x128xf32>
    %112 = vector.extract_strided_slice %110 {offsets = [0, 128], sizes = [8, 128], strides = [1, 1]} : vector<8x256xf32> to vector<8x128xf32>
    %113 = vector.extract_strided_slice %104 {offsets = [0, 256], sizes = [8, 128], strides = [1, 1]} : vector<8x512xf32> to vector<8x128xf32>
    %114 = math.tanh %113 : vector<8x128xf32>
    %115 = vector.extract_strided_slice %104 {offsets = [0, 384], sizes = [8, 128], strides = [1, 1]} : vector<8x512xf32> to vector<8x128xf32>
    %116 = arith.negf %115 : vector<8x128xf32>
    %117 = math.exp %116 : vector<8x128xf32>
    %cst_31 = arith.constant 1.000000e+00 : f32
    %118 = vector.broadcast %cst_31 : f32 to vector<8x128xf32>
    %119 = arith.addf %118, %117 : vector<8x128xf32>
    %120 = arith.divf %118, %119 : vector<8x128xf32>
    %121 = arith.mulf %112, %92 : vector<8x128xf32>
    %122 = arith.mulf %111, %114 : vector<8x128xf32>
    %123 = arith.addf %121, %122 : vector<8x128xf32>
    %124 = math.tanh %123 : vector<8x128xf32>
    %125 = arith.mulf %120, %124 : vector<8x128xf32>
    %126 = arith.index_cast %c3_i32 : i32 to index
    %c0_32 = arith.constant 0 : index
    %c0_33 = arith.constant 0 : index
    %127 = vector.load %arg3[%126, %c0_32, %c0_33] : memref<8x8x128xf32, #tpu.memory_space<vmem>>, vector<1x8x128xf32>
    %128 = vector.shape_cast %127 : vector<1x8x128xf32> to vector<8x128xf32>
    %129 = vector.shape_cast %125 : vector<8x128xf32> to vector<1x8x128xf32>
    tpu.vector_store %arg3[%126, %c0_32, %c0_33], %129 {strides = array<i32>} : memref<8x8x128xf32, #tpu.memory_space<vmem>>, vector<1x8x128xf32>,
    %c4_i32 = arith.constant 4 : i32
    %130 = arith.index_cast %c4_i32 : i32 to index
    %c0_34 = arith.constant 0 : index
    %c0_35 = arith.constant 0 : index
    %131 = vector.load %arg1[%130, %c0_34, %c0_35] : memref<8x8x512xf32, #tpu.memory_space<vmem>>, vector<1x8x512xf32>
    %132 = vector.shape_cast %131 : vector<1x8x512xf32> to vector<8x512xf32>
    %133 = arith.truncf %125 : vector<8x128xf32> to vector<8x128xbf16>
    %cst_36 = arith.constant dense<0.000000e+00> : vector<8x512xf32>
    %134 = tpu.matmul %133, %3, %cst_36 {dimension_numbers = #tpu.dot_dimension_numbers<[1], [0], [0], [1], [0, 0, 1, 1], [], []>} : vector<8x128xbf16>, vector<128x512xbf16>, vector<8x512xf32> -> vector<8x512xf32>
    %135 = arith.addf %132, %134 : vector<8x512xf32>
    %136 = vector.extract_strided_slice %135 {offsets = [0, 0], sizes = [8, 256], strides = [1, 1]} : vector<8x512xf32> to vector<8x256xf32>
    %137 = arith.negf %136 : vector<8x256xf32>
    %138 = math.exp %137 : vector<8x256xf32>
    %cst_37 = arith.constant 1.000000e+00 : f32
    %139 = vector.broadcast %cst_37 : f32 to vector<8x256xf32>
    %140 = arith.addf %139, %138 : vector<8x256xf32>
    %141 = arith.divf %139, %140 : vector<8x256xf32>
    %142 = vector.extract_strided_slice %141 {offsets = [0, 0], sizes = [8, 128], strides = [1, 1]} : vector<8x256xf32> to vector<8x128xf32>
    %143 = vector.extract_strided_slice %141 {offsets = [0, 128], sizes = [8, 128], strides = [1, 1]} : vector<8x256xf32> to vector<8x128xf32>
    %144 = vector.extract_strided_slice %135 {offsets = [0, 256], sizes = [8, 128], strides = [1, 1]} : vector<8x512xf32> to vector<8x128xf32>
    %145 = math.tanh %144 : vector<8x128xf32>
    %146 = vector.extract_strided_slice %135 {offsets = [0, 384], sizes = [8, 128], strides = [1, 1]} : vector<8x512xf32> to vector<8x128xf32>
    %147 = arith.negf %146 : vector<8x128xf32>
    %148 = math.exp %147 : vector<8x128xf32>
    %cst_38 = arith.constant 1.000000e+00 : f32
    %149 = vector.broadcast %cst_38 : f32 to vector<8x128xf32>
    %150 = arith.addf %149, %148 : vector<8x128xf32>
    %151 = arith.divf %149, %150 : vector<8x128xf32>
    %152 = arith.mulf %143, %123 : vector<8x128xf32>
    %153 = arith.mulf %142, %145 : vector<8x128xf32>
    %154 = arith.addf %152, %153 : vector<8x128xf32>
    %155 = math.tanh %154 : vector<8x128xf32>
    %156 = arith.mulf %151, %155 : vector<8x128xf32>
    %157 = arith.index_cast %c4_i32 : i32 to index
    %c0_39 = arith.constant 0 : index
    %c0_40 = arith.constant 0 : index
    %158 = vector.load %arg3[%157, %c0_39, %c0_40] : memref<8x8x128xf32, #tpu.memory_space<vmem>>, vector<1x8x128xf32>
    %159 = vector.shape_cast %158 : vector<1x8x128xf32> to vector<8x128xf32>
    %160 = vector.shape_cast %156 : vector<8x128xf32> to vector<1x8x128xf32>
    tpu.vector_store %arg3[%157, %c0_39, %c0_40], %160 {strides = array<i32>} : memref<8x8x128xf32, #tpu.memory_space<vmem>>, vector<1x8x128xf32>,
    %c5_i32 = arith.constant 5 : i32
    %161 = arith.index_cast %c5_i32 : i32 to index
    %c0_41 = arith.constant 0 : index
    %c0_42 = arith.constant 0 : index
    %162 = vector.load %arg1[%161, %c0_41, %c0_42] : memref<8x8x512xf32, #tpu.memory_space<vmem>>, vector<1x8x512xf32>
    %163 = vector.shape_cast %162 : vector<1x8x512xf32> to vector<8x512xf32>
    %164 = arith.truncf %156 : vector<8x128xf32> to vector<8x128xbf16>
    %cst_43 = arith.constant dense<0.000000e+00> : vector<8x512xf32>
    %165 = tpu.matmul %164, %3, %cst_43 {dimension_numbers = #tpu.dot_dimension_numbers<[1], [0], [0], [1], [0, 0, 1, 1], [], []>} : vector<8x128xbf16>, vector<128x512xbf16>, vector<8x512xf32> -> vector<8x512xf32>
    %166 = arith.addf %163, %165 : vector<8x512xf32>
    %167 = vector.extract_strided_slice %166 {offsets = [0, 0], sizes = [8, 256], strides = [1, 1]} : vector<8x512xf32> to vector<8x256xf32>
    %168 = arith.negf %167 : vector<8x256xf32>
    %169 = math.exp %168 : vector<8x256xf32>
    %cst_44 = arith.constant 1.000000e+00 : f32
    %170 = vector.broadcast %cst_44 : f32 to vector<8x256xf32>
    %171 = arith.addf %170, %169 : vector<8x256xf32>
    %172 = arith.divf %170, %171 : vector<8x256xf32>
    %173 = vector.extract_strided_slice %172 {offsets = [0, 0], sizes = [8, 128], strides = [1, 1]} : vector<8x256xf32> to vector<8x128xf32>
    %174 = vector.extract_strided_slice %172 {offsets = [0, 128], sizes = [8, 128], strides = [1, 1]} : vector<8x256xf32> to vector<8x128xf32>
    %175 = vector.extract_strided_slice %166 {offsets = [0, 256], sizes = [8, 128], strides = [1, 1]} : vector<8x512xf32> to vector<8x128xf32>
    %176 = math.tanh %175 : vector<8x128xf32>
    %177 = vector.extract_strided_slice %166 {offsets = [0, 384], sizes = [8, 128], strides = [1, 1]} : vector<8x512xf32> to vector<8x128xf32>
    %178 = arith.negf %177 : vector<8x128xf32>
    %179 = math.exp %178 : vector<8x128xf32>
    %cst_45 = arith.constant 1.000000e+00 : f32
    %180 = vector.broadcast %cst_45 : f32 to vector<8x128xf32>
    %181 = arith.addf %180, %179 : vector<8x128xf32>
    %182 = arith.divf %180, %181 : vector<8x128xf32>
    %183 = arith.mulf %174, %154 : vector<8x128xf32>
    %184 = arith.mulf %173, %176 : vector<8x128xf32>
    %185 = arith.addf %183, %184 : vector<8x128xf32>
    %186 = math.tanh %185 : vector<8x128xf32>
    %187 = arith.mulf %182, %186 : vector<8x128xf32>
    %188 = arith.index_cast %c5_i32 : i32 to index
    %c0_46 = arith.constant 0 : index
    %c0_47 = arith.constant 0 : index
    %189 = vector.load %arg3[%188, %c0_46, %c0_47] : memref<8x8x128xf32, #tpu.memory_space<vmem>>, vector<1x8x128xf32>
    %190 = vector.shape_cast %189 : vector<1x8x128xf32> to vector<8x128xf32>
    %191 = vector.shape_cast %187 : vector<8x128xf32> to vector<1x8x128xf32>
    tpu.vector_store %arg3[%188, %c0_46, %c0_47], %191 {strides = array<i32>} : memref<8x8x128xf32, #tpu.memory_space<vmem>>, vector<1x8x128xf32>,
    %c6_i32 = arith.constant 6 : i32
    %192 = arith.index_cast %c6_i32 : i32 to index
    %c0_48 = arith.constant 0 : index
    %c0_49 = arith.constant 0 : index
    %193 = vector.load %arg1[%192, %c0_48, %c0_49] : memref<8x8x512xf32, #tpu.memory_space<vmem>>, vector<1x8x512xf32>
    %194 = vector.shape_cast %193 : vector<1x8x512xf32> to vector<8x512xf32>
    %195 = arith.truncf %187 : vector<8x128xf32> to vector<8x128xbf16>
    %cst_50 = arith.constant dense<0.000000e+00> : vector<8x512xf32>
    %196 = tpu.matmul %195, %3, %cst_50 {dimension_numbers = #tpu.dot_dimension_numbers<[1], [0], [0], [1], [0, 0, 1, 1], [], []>} : vector<8x128xbf16>, vector<128x512xbf16>, vector<8x512xf32> -> vector<8x512xf32>
    %197 = arith.addf %194, %196 : vector<8x512xf32>
    %198 = vector.extract_strided_slice %197 {offsets = [0, 0], sizes = [8, 256], strides = [1, 1]} : vector<8x512xf32> to vector<8x256xf32>
    %199 = arith.negf %198 : vector<8x256xf32>
    %200 = math.exp %199 : vector<8x256xf32>
    %cst_51 = arith.constant 1.000000e+00 : f32
    %201 = vector.broadcast %cst_51 : f32 to vector<8x256xf32>
    %202 = arith.addf %201, %200 : vector<8x256xf32>
    %203 = arith.divf %201, %202 : vector<8x256xf32>
    %204 = vector.extract_strided_slice %203 {offsets = [0, 0], sizes = [8, 128], strides = [1, 1]} : vector<8x256xf32> to vector<8x128xf32>
    %205 = vector.extract_strided_slice %203 {offsets = [0, 128], sizes = [8, 128], strides = [1, 1]} : vector<8x256xf32> to vector<8x128xf32>
    %206 = vector.extract_strided_slice %197 {offsets = [0, 256], sizes = [8, 128], strides = [1, 1]} : vector<8x512xf32> to vector<8x128xf32>
    %207 = math.tanh %206 : vector<8x128xf32>
    %208 = vector.extract_strided_slice %197 {offsets = [0, 384], sizes = [8, 128], strides = [1, 1]} : vector<8x512xf32> to vector<8x128xf32>
    %209 = arith.negf %208 : vector<8x128xf32>
    %210 = math.exp %209 : vector<8x128xf32>
    %cst_52 = arith.constant 1.000000e+00 : f32
    %211 = vector.broadcast %cst_52 : f32 to vector<8x128xf32>
    %212 = arith.addf %211, %210 : vector<8x128xf32>
    %213 = arith.divf %211, %212 : vector<8x128xf32>
    %214 = arith.mulf %205, %185 : vector<8x128xf32>
    %215 = arith.mulf %204, %207 : vector<8x128xf32>
    %216 = arith.addf %214, %215 : vector<8x128xf32>
    %217 = math.tanh %216 : vector<8x128xf32>
    %218 = arith.mulf %213, %217 : vector<8x128xf32>
    %219 = arith.index_cast %c6_i32 : i32 to index
    %c0_53 = arith.constant 0 : index
    %c0_54 = arith.constant 0 : index
    %220 = vector.load %arg3[%219, %c0_53, %c0_54] : memref<8x8x128xf32, #tpu.memory_space<vmem>>, vector<1x8x128xf32>
    %221 = vector.shape_cast %220 : vector<1x8x128xf32> to vector<8x128xf32>
    %222 = vector.shape_cast %218 : vector<8x128xf32> to vector<1x8x128xf32>
    tpu.vector_store %arg3[%219, %c0_53, %c0_54], %222 {strides = array<i32>} : memref<8x8x128xf32, #tpu.memory_space<vmem>>, vector<1x8x128xf32>,
    %c7_i32 = arith.constant 7 : i32
    %223 = arith.index_cast %c7_i32 : i32 to index
    %c0_55 = arith.constant 0 : index
    %c0_56 = arith.constant 0 : index
    %224 = vector.load %arg1[%223, %c0_55, %c0_56] : memref<8x8x512xf32, #tpu.memory_space<vmem>>, vector<1x8x512xf32>
    %225 = vector.shape_cast %224 : vector<1x8x512xf32> to vector<8x512xf32>
    %226 = arith.truncf %218 : vector<8x128xf32> to vector<8x128xbf16>
    %cst_57 = arith.constant dense<0.000000e+00> : vector<8x512xf32>
    %227 = tpu.matmul %226, %3, %cst_57 {dimension_numbers = #tpu.dot_dimension_numbers<[1], [0], [0], [1], [0, 0, 1, 1], [], []>} : vector<8x128xbf16>, vector<128x512xbf16>, vector<8x512xf32> -> vector<8x512xf32>
    %228 = arith.addf %225, %227 : vector<8x512xf32>
    %229 = vector.extract_strided_slice %228 {offsets = [0, 0], sizes = [8, 256], strides = [1, 1]} : vector<8x512xf32> to vector<8x256xf32>
    %230 = arith.negf %229 : vector<8x256xf32>
    %231 = math.exp %230 : vector<8x256xf32>
    %cst_58 = arith.constant 1.000000e+00 : f32
    %232 = vector.broadcast %cst_58 : f32 to vector<8x256xf32>
    %233 = arith.addf %232, %231 : vector<8x256xf32>
    %234 = arith.divf %232, %233 : vector<8x256xf32>
    %235 = vector.extract_strided_slice %234 {offsets = [0, 0], sizes = [8, 128], strides = [1, 1]} : vector<8x256xf32> to vector<8x128xf32>
    %236 = vector.extract_strided_slice %234 {offsets = [0, 128], sizes = [8, 128], strides = [1, 1]} : vector<8x256xf32> to vector<8x128xf32>
    %237 = vector.extract_strided_slice %228 {offsets = [0, 256], sizes = [8, 128], strides = [1, 1]} : vector<8x512xf32> to vector<8x128xf32>
    %238 = math.tanh %237 : vector<8x128xf32>
    %239 = vector.extract_strided_slice %228 {offsets = [0, 384], sizes = [8, 128], strides = [1, 1]} : vector<8x512xf32> to vector<8x128xf32>
    %240 = arith.negf %239 : vector<8x128xf32>
    %241 = math.exp %240 : vector<8x128xf32>
    %cst_59 = arith.constant 1.000000e+00 : f32
    %242 = vector.broadcast %cst_59 : f32 to vector<8x128xf32>
    %243 = arith.addf %242, %241 : vector<8x128xf32>
    %244 = arith.divf %242, %243 : vector<8x128xf32>
    %245 = arith.mulf %236, %216 : vector<8x128xf32>
    %246 = arith.mulf %235, %238 : vector<8x128xf32>
    %247 = arith.addf %245, %246 : vector<8x128xf32>
    %248 = math.tanh %247 : vector<8x128xf32>
    %249 = arith.mulf %244, %248 : vector<8x128xf32>
    %250 = arith.index_cast %c7_i32 : i32 to index
    %c0_60 = arith.constant 0 : index
    %c0_61 = arith.constant 0 : index
    %251 = vector.load %arg3[%250, %c0_60, %c0_61] : memref<8x8x128xf32, #tpu.memory_space<vmem>>, vector<1x8x128xf32>
    %252 = vector.shape_cast %251 : vector<1x8x128xf32> to vector<8x128xf32>
    %253 = vector.shape_cast %249 : vector<8x128xf32> to vector<1x8x128xf32>
    tpu.vector_store %arg3[%250, %c0_60, %c0_61], %253 {strides = array<i32>} : memref<8x8x128xf32, #tpu.memory_space<vmem>>, vector<1x8x128xf32>,
    %c8_i32 = arith.constant 8 : i32
    %c0_62 = arith.constant 0 : index
    %c0_63 = arith.constant 0 : index
    %254 = vector.load %arg6[%c0_62, %c0_63] : memref<8x128xf32, #tpu.memory_space<vmem>>, vector<8x128xf32>
    tpu.vector_store %arg6[%c0_62, %c0_63], %249 {strides = array<i32>} : memref<8x128xf32, #tpu.memory_space<vmem>>, vector<8x128xf32>,
    %c0_64 = arith.constant 0 : index
    %c0_65 = arith.constant 0 : index
    %255 = vector.load %arg7[%c0_64, %c0_65] : memref<8x128xf32, #tpu.memory_space<vmem>>, vector<8x128xf32>
    tpu.vector_store %arg7[%c0_64, %c0_65], %247 {strides = array<i32>} : memref<8x128xf32, #tpu.memory_space<vmem>>, vector<8x128xf32>,
    %c0_i32_66 = arith.constant 0 : i32
    %256 = arith.cmpi eq, %arg0, %c0_i32_66 : i32
    %257 = arith.extui %256 : i1 to i32
    %c0_i32_67 = arith.constant 0 : i32
    %258 = arith.cmpi ne, %257, %c0_i32_67 : i32
    scf.if %258 {
      %c0_68 = arith.constant 0 : index
      %c0_69 = arith.constant 0 : index
      %259 = vector.load %arg4[%c0_68, %c0_69] : memref<8x128xf32, #tpu.memory_space<vmem>>, vector<8x128xf32>
      tpu.vector_store %arg4[%c0_68, %c0_69], %249 {strides = array<i32>} : memref<8x128xf32, #tpu.memory_space<vmem>>, vector<8x128xf32>,
      %c0_70 = arith.constant 0 : index
      %c0_71 = arith.constant 0 : index
      %260 = vector.load %arg5[%c0_70, %c0_71] : memref<8x128xf32, #tpu.memory_space<vmem>>, vector<8x128xf32>
      tpu.vector_store %arg5[%c0_70, %c0_71], %247 {strides = array<i32>} : memref<8x128xf32, #tpu.memory_space<vmem>>, vector<8x128xf32>,
    } else {
    }
    return
  }
  func.func @transform_0(%arg0: i32) -> (i32, i32, i32) {
    %c0_i32 = arith.constant 0 : i32
    %c0_i32_0 = arith.constant 0 : i32
    %c0_i32_1 = arith.constant 0 : i32
    return %arg0, %c0_i32, %c0_i32_0 : i32, i32, i32
  }
  func.func @transform_1(%arg0: i32) -> (i32, i32) {
    %c0_i32 = arith.constant 0 : i32
    %c0_i32_0 = arith.constant 0 : i32
    %c0_i32_1 = arith.constant 0 : i32
    return %c0_i32, %c0_i32_0 : i32, i32
  }
  func.func @transform_2(%arg0: i32) -> (i32, i32, i32) {
    %c0_i32 = arith.constant 0 : i32
    %c0_i32_0 = arith.constant 0 : i32
    %c0_i32_1 = arith.constant 0 : i32
    return %arg0, %c0_i32, %c0_i32_0 : i32, i32, i32
  }
  func.func @transform_3(%arg0: i32) -> (i32, i32) {
    %c0_i32 = arith.constant 0 : i32
    %c0_i32_0 = arith.constant 0 : i32
    %c0_i32_1 = arith.constant 0 : i32
    return %c0_i32, %c0_i32_0 : i32, i32
  }
  func.func @transform_4(%arg0: i32) -> (i32, i32) {
    %c0_i32 = arith.constant 0 : i32
    %c0_i32_0 = arith.constant 0 : i32
    %c0_i32_1 = arith.constant 0 : i32
    return %c0_i32, %c0_i32_0 : i32, i32
  }
}

</mosaic_0001>

<bundles_post_ra>
// kernel: encoder_lstm_forward.2
= control target key start
LH: loop header
LB: loop body
LE: loop exit
PB: predicated region body
PF: predicated region fallthrough
CT: control target
= control target key end

     0   :  { %v1477_v1 = vmov 0   ;;  %v1478_v33 = vmov 0.0|0.0   ;;  %s2150_s1 = inlined_call_operand.vmem [shape: bf16[128,512], index: 1, kind: input, shape index: {}]   ;;  %s2151_s0 = inlined_call_operand.vmem [shape: f32[8,8,512], index: 0, kind: input, shape index: {}]   ;;  %s2152_s2 = inlined_call_operand.vmem [shape: f32[8,8,128], index: 2, kind: output, shape index: {0}]   ;;  %s2153_s4 = inlined_call_operand.vmem [shape: f32[8,128], index: 4, kind: output, shape index: {2}]   ;;  %s2154_s3 = inlined_call_operand.vmem [shape: f32[8,128], index: 3, kind: output, shape index: {1}]  }
   0x1   :  { %v1507_v0 = vld [vmem:[%s2150_s1 + $0xe4] ss:$16 sps:$4 sm:$0xff]   ;;  %252 = vmatprep.mubr.bf16.mxu0 %v1477_v1  ;;  %293 = vmatprep.mubr.bf16.mxu1 %v1477_v1  ;;  %v1514_v2 = vld [vmem:[%s2150_s1 + $0xe0] ss:$16 sps:$4 sm:$0xff]   ;;  %v1537_v6 = vld [vmem:[%s2150_s1 + $0xec] ss:$16 sps:$4 sm:$0xff]  }
   0x2   :  { %220 = vmatprep.subr.bf16.mxu0 %v1507_v0  ;;  %v1520_v3 = vld [vmem:[%s2150_s1 + $0xc4] ss:$16 sps:$4 sm:$0xff]   ;;  %v1526_v4 = vld [vmem:[%s2150_s1 + $0xc0] ss:$16 sps:$4 sm:$0xff]   ;;  %v1542_v7 = vld [vmem:[%s2150_s1 + $0xe8] ss:$16 sps:$4 sm:$0xff]   ;;  %261 = vmatprep.subr.bf16.mxu1 %v1537_v6 }
   0x3   :  { %221 = vmatpush1.bf16.msra.mxu0 %v1514_v2  ;;  %v1532_v5 = vld [vmem:[%s2150_s1 + $0xa4] ss:$16 sps:$4 sm:$0xff]   ;;  %v1548_v8 = vld [vmem:[%s2150_s1 + $0xa0] ss:$16 sps:$4 sm:$0xff]   ;;  %262 = vmatpush1.bf16.msra.mxu1 %v1542_v7  ;;  %v1561_v10 = vld [vmem:[%s2150_s1 + $0xcc] ss:$16 sps:$4 sm:$0xff]  }
   0x4   :  { %222 = vmatprep.subr.bf16.mxu0 %v1520_v3  ;;  %v1555_v9 = vld [vmem:[%s2150_s1 + $0x84] ss:$16 sps:$4 sm:$0xff]   ;;  %v1566_v11 = vld [vmem:[%s2150_s1 + $0xc8] ss:$16 sps:$4 sm:$0xff]   ;;  %263 = vmatprep.subr.bf16.mxu1 %v1561_v10  ;;  %v1573_v12 = vld [vmem:[%s2150_s1 + $0x80] ss:$16 sps:$4 sm:$0xff]  }
   0x5   :  { %v1578_v13 = vld [vmem:[%s2150_s1 + $0x64] ss:$16 sps:$4 sm:$0xff]   ;;  %v1583_v14 = vld [vmem:[%s2150_s1 + $0xac] ss:$16 sps:$4 sm:$0xff]   ;;  %v1590_v15 = vld [vmem:[%s2150_s1 + $0xa8] ss:$16 sps:$4 sm:$0xff]  }
   0x6   :  { %v1596_v16 = vld [vmem:[%s2150_s1 + $0x8c] ss:$16 sps:$4 sm:$0xff]   ;;  %v1602_v17 = vld [vmem:[%s2150_s1 + $0x60] ss:$16 sps:$4 sm:$0xff]   ;;  %v1608_v18 = vld [vmem:[%s2150_s1 + $0x44] ss:$16 sps:$4 sm:$0xff]  }
   0x7   :  { %223 = vmatpush1.bf16.msra.mxu0 %v1526_v4  ;;  %264 = vmatpush1.bf16.msra.mxu1 %v1566_v11  ;;  %v1614_v19 = vld [vmem:[%s2150_s1 + $0x88] ss:$16 sps:$4 sm:$0xff]   ;;  %v1620_v20 = vld [vmem:[%s2150_s1 + $0x6c] ss:$16 sps:$4 sm:$0xff]   ;;  %v1626_v21 = vld [vmem:[%s2150_s1 + $0x40] ss:$16 sps:$4 sm:$0xff]  }
   0x8   :  { %224 = vmatprep.subr.bf16.mxu0 %v1532_v5  ;;  %265 = vmatprep.subr.bf16.mxu1 %v1583_v14  ;;  %v1631_v22 = vld [vmem:[%s2150_s1 + $0x24] ss:$16 sps:$4 sm:$0xff]   ;;  %v1638_v23 = vld [vmem:[%s2150_s1 + $0x68] ss:$16 sps:$4 sm:$0xff]   ;;  %v1644_v24 = vld [vmem:[%s2150_s1 + $0x4c] ss:$16 sps:$4 sm:$0xff]  }
   0x9   :  { %v1650_v25 = vld [vmem:[%s2150_s1 + $0x20] ss:$16 sps:$4 sm:$0xff]   ;;  %v1656_v26 = vld [vmem:[%s2150_s1 + $0x4] ss:$16 sps:$4 sm:$0xff]   ;;  %v1662_v27 = vld [vmem:[%s2150_s1 + $0x48] ss:$16 sps:$4 sm:$0xff]  }
   0xa   :  { %v1668_v28 = vld [vmem:[%s2150_s1 + $0x2c] ss:$16 sps:$4 sm:$0xff]   ;;  %v1674_v29 = vld [vmem:[%s2150_s1] ss:$16 sps:$4 sm:$0xff]   ;;  %v1681_v30 = vld [vmem:[%s2150_s1 + $0x28] ss:$16 sps:$4 sm:$0xff]  }
   0xb   :  { %225 = vmatpush1.bf16.msra.mxu0 %v1548_v8  ;;  %266 = vmatpush1.bf16.msra.mxu1 %v1590_v15  ;;  %v1687_v31 = vld [vmem:[%s2150_s1 + $0xc] ss:$16 sps:$4 sm:$0xff]   ;;  %v1694_v32 = vld [vmem:[%s2150_s1 + $0x8] ss:$16 sps:$4 sm:$0xff]   ;;  %v55_v34 = vld [vmem:[%s2151_s0] sm:$0xff] }
   0xc   :  { %226 = vmatprep.subr.bf16.mxu0 %v1555_v9  ;;  %267 = vmatprep.subr.bf16.mxu1 %v1596_v16  ;;  %v56_v36 = vld [vmem:[%s2151_s0 + $0x8] sm:$0xff]  ;;  %v58_v46 = vld [vmem:[%s2151_s0 + $0x18] sm:$0xff]  ;;  %v57_v49 = vld [vmem:[%s2151_s0 + $0x10] sm:$0xff] }
   0xf   :  { %227 = vmatpush1.bf16.msra.mxu0 %v1573_v12  ;;  %268 = vmatpush1.bf16.msra.mxu1 %v1614_v19 }
  0x10   :  { %228 = vmatprep.subr.bf16.mxu0 %v1578_v13  ;;  %269 = vmatprep.subr.bf16.mxu1 %v1620_v20 }
  0x13   :  { %229 = vmatpush1.bf16.msra.mxu0 %v1602_v17  ;;  %270 = vmatpush1.bf16.msra.mxu1 %v1638_v23 }
  0x14   :  { %230 = vmatprep.subr.bf16.mxu0 %v1608_v18  ;;  %271 = vmatprep.subr.bf16.mxu1 %v1644_v24 }
  0x17   :  { %231 = vmatpush1.bf16.msra.mxu0 %v1626_v21  ;;  %272 = vmatpush1.bf16.msra.mxu1 %v1662_v27 }
  0x18   :  { %232 = vmatprep.subr.bf16.mxu0 %v1631_v22  ;;  %273 = vmatprep.subr.bf16.mxu1 %v1668_v28 }
  0x1b   :  { %233 = vmatpush1.bf16.msra.mxu0 %v1650_v25  ;;  %274 = vmatpush1.bf16.msra.mxu1 %v1681_v30 }
  0x1c   :  { %234 = vmatprep.subr.bf16.mxu0 %v1656_v26  ;;  %275 = vmatprep.subr.bf16.mxu1 %v1687_v31 }
  0x1f   :  { %235 = vmatpush1.bf16.msra.mxu0 %v1674_v29  ;;  %276 = vmatpush1.bf16.msra.mxu1 %v1694_v32 }
  0x20   :  { %337 = vmatprep.subr.bf16.mxu0 %v1507_v0  ;;  %378 = vmatprep.subr.bf16.mxu1 %v1537_v6 }
  0x22   :  { %253 = vmatmul.mubr.bf16.vlgmr.msra.gmra.mxu0 %v1478_v33  ;;  %294 = vmatmul.mubr.bf16.vlgmr.msra.gmra.mxu1 %v1478_v33 }
  0x23   :  { %338 = vmatpush1.bf16.msra.mxu0 %v1514_v2  ;;  %369 = vmatprep.mubr.bf16.mxu0 %v1477_v1 }
  0x24   :  { %339 = vmatprep.subr.bf16.mxu0 %v1520_v3  ;;  %379 = vmatpush1.bf16.msra.mxu1 %v1542_v7 }
  0x25   :  { %380 = vmatprep.subr.bf16.mxu1 %v1561_v10  ;;  %410 = vmatprep.mubr.bf16.mxu1 %v1477_v1 }
  0x27   :  { %340 = vmatpush1.bf16.msra.mxu0 %v1526_v4 }
  0x28   :  { %341 = vmatprep.subr.bf16.mxu0 %v1532_v5  ;;  %381 = vmatpush1.bf16.msra.mxu1 %v1566_v11 }
  0x29   :  { %382 = vmatprep.subr.bf16.mxu1 %v1583_v14 }
  0x2b   :  { %342 = vmatpush1.bf16.msra.mxu0 %v1548_v8 }
  0x2c   :  { %343 = vmatprep.subr.bf16.mxu0 %v1555_v9  ;;  %383 = vmatpush1.bf16.msra.mxu1 %v1590_v15 }
  0x2d   :  { %384 = vmatprep.subr.bf16.mxu1 %v1596_v16 }
  0x2f   :  { %344 = vmatpush1.bf16.msra.mxu0 %v1573_v12 }
  0x30   :  { %345 = vmatprep.subr.bf16.mxu0 %v1578_v13  ;;  %385 = vmatpush1.bf16.msra.mxu1 %v1614_v19 }
  0x31   :  { %386 = vmatprep.subr.bf16.mxu1 %v1620_v20 }
  0x33   :  { %346 = vmatpush1.bf16.msra.mxu0 %v1602_v17 }
  0x34   :  { %347 = vmatprep.subr.bf16.mxu0 %v1608_v18  ;;  %387 = vmatpush1.bf16.msra.mxu1 %v1638_v23 }
  0x35   :  { %388 = vmatprep.subr.bf16.mxu1 %v1644_v24 }
  0x37   :  { %348 = vmatpush1.bf16.msra.mxu0 %v1626_v21 }
  0x38   :  { %349 = vmatprep.subr.bf16.mxu0 %v1631_v22  ;;  %389 = vmatpush1.bf16.msra.mxu1 %v1662_v27 }
  0x39   :  { %390 = vmatprep.subr.bf16.mxu1 %v1668_v28 }
  0x3b   :  { %350 = vmatpush1.bf16.msra.mxu0 %v1650_v25 }
  0x3c   :  { %351 = vmatprep.subr.bf16.mxu0 %v1656_v26  ;;  %391 = vmatpush1.bf16.msra.mxu1 %v1681_v30 }
  0x3d   :  { %392 = vmatprep.subr.bf16.mxu1 %v1687_v31 }
  0x3f   :  { %352 = vmatpush1.bf16.msra.mxu0 %v1674_v29 }
  0x40   :  { %455 = vmatprep.subr.bf16.mxu0 %v1507_v0  ;;  %393 = vmatpush1.bf16.msra.mxu1 %v1694_v32 }
  0x41   :  { %496 = vmatprep.subr.bf16.mxu1 %v1537_v6 }
  0xe2   :  { %v254_v35 = vpop.f32.mrf.mxu0  ;;  %v295_v43 = vpop.f32.mrf.mxu1 }
  0xe3   :  { %v302_v37 = vadd.f32 %v254_v35, %v55_v34  ;;  %v304_v51 = vadd.f32 %v295_v43, %v57_v49 }
  0xe4   :  { %v256_v38 = vpop.f32.mrf.mxu0  ;;  %v297_v45 = vpop.f32.mrf.mxu1 }
  0xe5   :  { %v1208_v39 = vmul.f32 -1.442695, %v302_v37  ;;  %v303_v40 = vadd.f32 %v256_v38, %v56_v36  ;;  %v305_v50 = vadd.f32 %v297_v45, %v58_v46  ;;  %v1211_v38 = vld [vmem:[%s2151_s0 + $0x20] sm:$0xff] }
  0xe6   :  { %v258_v41 = vpop.f32.mrf.mxu0  ;;  %v299_v47 = vpop.f32.mrf.mxu1 }
  0xe7   :  { %1317 = vpow2.f32 %v1208_v39  ;;  %v1209_v42 = vmul.f32 -1.442695, %v303_v40  ;;  %v1210_v52 = vmul.f32 -1.442695, %v305_v50  ;;  %v1212_v41 = vld [vmem:[%s2151_s0 + $0x28] sm:$0xff] }
  0xe8   :  { %v259_v44 = vpop.f32.mrf.mxu0  ;;  %v300_v48 = vpop.f32.mrf.mxu1 }
  0xe9   :  { %1319 = vpow2.f32 %v1209_v42 }
  0xea   :  { %1321 = vtanh.f32 %v304_v51 }
  0xeb   :  { %1323 = vpow2.f32 %v1210_v52  ;;  %v1214_v52 = vld [vmem:[%s2151_s0 + $0x38] sm:$0xff] }
  0xf4   :  { %v1318_v53 = vpop.eup %1317 }
  0xf5   :  { %v312_v54 = vadd.f32 1.0, %v1318_v53 }
  0xf6   :  { %v1320_v55 = vpop.eup %1319 }
  0xf7   :  { %1325 = vrcp.f32 %v312_v54  ;;  %v313_v56 = vadd.f32 1.0, %v1320_v55  ;;  %v1322_v57 = vpop.eup %1321  ;;  %v1213_v54 = vld [vmem:[%s2151_s0 + $0x30] sm:$0xff] }
  0xf8   :  { %v1324_v58 = vpop.eup %1323 }
  0xf9   :  { %1327 = vrcp.f32 %v313_v56  ;;  %v322_v61 = vadd.f32 1.0, %v1324_v58 }
  0xfb   :  { %1329 = vrcp.f32 %v322_v61 }
 0x104   :  { %v1326_v59 = vpop.eup %1325 }
 0x105   :  { %v326_v63 = vmul.f32 %v1326_v59, %v1322_v57 }
 0x106   :  { %v1328_v60 = vpop.eup %1327 }
 0x107   :  { %v325_v62 = vmul.f32 0.0, %v1328_v60 }
 0x108   :  { %v1330_v34 = vpop.eup %1329 }
 0x109   :  { %v1746_v33 = vadd.f32 %v326_v63, %v325_v62 }
 0x10b   :  { %1331 = vtanh.f32 %v1746_v33 }
 0x118   :  { %v1332_v35 = vpop.eup %1331 }
 0x119   :  { %v329_v36 = vmul.f32 %v1332_v35, %v1330_v34 }
 0x11b   :  { %330 = vst [vmem:[%s2152_s2] sm:$0xff] %v329_v36  ;;  %v336_v37 = vpack.c.bf16 %v329_v36, %v329_v36 }
 0x11d   :  { %370 = vmatmul.mubr.bf16.vlgmr.msra.gmra.mxu0 %v336_v37  ;;  %411 = vmatmul.mubr.bf16.vlgmr.msra.gmra.mxu1 %v336_v37 }
 0x11e   :  { %456 = vmatpush1.bf16.msra.mxu0 %v1514_v2  ;;  %497 = vmatpush1.bf16.msra.mxu1 %v1542_v7 }
 0x11f   :  { %457 = vmatprep.subr.bf16.mxu0 %v1520_v3  ;;  %498 = vmatprep.subr.bf16.mxu1 %v1561_v10 }
 0x120   :  { %487 = vmatprep.mubr.bf16.mxu0 %v1477_v1  ;;  %528 = vmatprep.mubr.bf16.mxu1 %v1477_v1 }
 0x122   :  { %458 = vmatpush1.bf16.msra.mxu0 %v1526_v4  ;;  %499 = vmatpush1.bf16.msra.mxu1 %v1566_v11 }
 0x123   :  { %459 = vmatprep.subr.bf16.mxu0 %v1532_v5  ;;  %500 = vmatprep.subr.bf16.mxu1 %v1583_v14 }
 0x126   :  { %460 = vmatpush1.bf16.msra.mxu0 %v1548_v8  ;;  %501 = vmatpush1.bf16.msra.mxu1 %v1590_v15 }
 0x127   :  { %461 = vmatprep.subr.bf16.mxu0 %v1555_v9  ;;  %502 = vmatprep.subr.bf16.mxu1 %v1596_v16 }
 0x12a   :  { %462 = vmatpush1.bf16.msra.mxu0 %v1573_v12  ;;  %503 = vmatpush1.bf16.msra.mxu1 %v1614_v19 }
 0x12b   :  { %463 = vmatprep.subr.bf16.mxu0 %v1578_v13  ;;  %504 = vmatprep.subr.bf16.mxu1 %v1620_v20 }
 0x12e   :  { %464 = vmatpush1.bf16.msra.mxu0 %v1602_v17  ;;  %505 = vmatpush1.bf16.msra.mxu1 %v1638_v23 }
 0x12f   :  { %465 = vmatprep.subr.bf16.mxu0 %v1608_v18  ;;  %506 = vmatprep.subr.bf16.mxu1 %v1644_v24 }
 0x132   :  { %466 = vmatpush1.bf16.msra.mxu0 %v1626_v21  ;;  %507 = vmatpush1.bf16.msra.mxu1 %v1662_v27 }
 0x133   :  { %467 = vmatprep.subr.bf16.mxu0 %v1631_v22  ;;  %508 = vmatprep.subr.bf16.mxu1 %v1668_v28 }
 0x136   :  { %468 = vmatpush1.bf16.msra.mxu0 %v1650_v25  ;;  %509 = vmatpush1.bf16.msra.mxu1 %v1681_v30 }
 0x137   :  { %469 = vmatprep.subr.bf16.mxu0 %v1656_v26  ;;  %510 = vmatprep.subr.bf16.mxu1 %v1687_v31 }
 0x13a   :  { %470 = vmatpush1.bf16.msra.mxu0 %v1674_v29  ;;  %511 = vmatpush1.bf16.msra.mxu1 %v1694_v32 }
 0x13b   :  { %573 = vmatprep.subr.bf16.mxu0 %v1507_v0  ;;  %614 = vmatprep.subr.bf16.mxu1 %v1537_v6 }
 0x1dd   :  { %v371_v39 = vpop.f32.mrf.mxu0  ;;  %v412_v40 = vpop.f32.mrf.mxu1 }
 0x1de   :  { %v419_v42 = vadd.f32 %v1211_v38, %v371_v39  ;;  %v421_v57 = vadd.f32 %v1213_v54, %v412_v40 }
 0x1df   :  { %v373_v43 = vpop.f32.mrf.mxu0  ;;  %v414_v44 = vpop.f32.mrf.mxu1 }
 0x1e0   :  { %v1215_v45 = vmul.f32 -1.442695, %v419_v42  ;;  %v420_v46 = vadd.f32 %v1212_v41, %v373_v43  ;;  %v422_v53 = vadd.f32 %v1214_v52, %v414_v44 }
 0x1e1   :  { %v375_v47 = vpop.f32.mrf.mxu0  ;;  %v416_v48 = vpop.f32.mrf.mxu1 }
 0x1e2   :  { %1333 = vpow2.f32 %v1215_v45  ;;  %v1216_v49 = vmul.f32 -1.442695, %v420_v46  ;;  %v1217_v55 = vmul.f32 -1.442695, %v422_v53  ;;  %v1220_v45 = vld [vmem:[%s2151_s0 + $0x48] sm:$0xff] }
 0x1e3   :  { %v376_v50 = vpop.f32.mrf.mxu0  ;;  %v417_v51 = vpop.f32.mrf.mxu1 }
 0x1e4   :  { %1335 = vpow2.f32 %v1216_v49 }
 0x1e5   :  { %1337 = vpow2.f32 %v1217_v55 }
 0x1ef   :  { %v1334_v56 = vpop.eup %1333 }
 0x1f0   :  { %v429_v58 = vadd.f32 1.0, %v1334_v56  ;;  %v1222_v56 = vld [vmem:[%s2151_s0 + $0x58] sm:$0xff] }
 0x1f1   :  { %v1336_v59 = vpop.eup %1335 }
 0x1f2   :  { %1339 = vrcp.f32 %v429_v58  ;;  %v430_v60 = vadd.f32 1.0, %v1336_v59  ;;  %v1338_v61 = vpop.eup %1337  ;;  %v1221_v58 = vld [vmem:[%s2151_s0 + $0x50] sm:$0xff] }
 0x1f3   :  { %1341 = vtanh.f32 %v421_v57  ;;  %v439_v35 = vadd.f32 1.0, %v1338_v61 }
 0x1f4   :  { %1343 = vrcp.f32 %v430_v60 }
 0x1f5   :  { %1345 = vrcp.f32 %v439_v35 }
 0x1ff   :  { %v1340_v62 = vpop.eup %1339 }
 0x200   :  { %v1342_v63 = vpop.eup %1341 }
 0x201   :  { %v1344_v34 = vpop.eup %1343  ;;  %v443_v36 = vmul.f32 %v1342_v63, %v1340_v62 }
 0x202   :  { %v442_v37 = vmul.f32 %v1344_v34, %v1746_v33  ;;  %v1346_v39 = vpop.eup %1345  ;;  %v1219_v33 = vld [vmem:[%s2151_s0 + $0x40] sm:$0xff] }
 0x204   :  { %v1799_v38 = vadd.f32 %v443_v36, %v442_v37 }
 0x206   :  { %1347 = vtanh.f32 %v1799_v38 }
 0x213   :  { %v1348_v40 = vpop.eup %1347 }
 0x214   :  { %v446_v41 = vmul.f32 %v1348_v40, %v1346_v39 }
 0x216   :  { %1218 = vst [vmem:[%s2152_s2 + $0x8] sm:$0xff] %v446_v41  ;;  %v454_v42 = vpack.c.bf16 %v446_v41, %v446_v41 }
 0x218   :  { %488 = vmatmul.mubr.bf16.vlgmr.msra.gmra.mxu0 %v454_v42  ;;  %529 = vmatmul.mubr.bf16.vlgmr.msra.gmra.mxu1 %v454_v42 }
 0x219   :  { %574 = vmatpush1.bf16.msra.mxu0 %v1514_v2  ;;  %615 = vmatpush1.bf16.msra.mxu1 %v1542_v7 }
 0x21a   :  { %575 = vmatprep.subr.bf16.mxu0 %v1520_v3  ;;  %616 = vmatprep.subr.bf16.mxu1 %v1561_v10 }
 0x21b   :  { %605 = vmatprep.mubr.bf16.mxu0 %v1477_v1  ;;  %646 = vmatprep.mubr.bf16.mxu1 %v1477_v1 }
 0x21d   :  { %576 = vmatpush1.bf16.msra.mxu0 %v1526_v4  ;;  %617 = vmatpush1.bf16.msra.mxu1 %v1566_v11 }
 0x21e   :  { %577 = vmatprep.subr.bf16.mxu0 %v1532_v5  ;;  %618 = vmatprep.subr.bf16.mxu1 %v1583_v14 }
 0x221   :  { %578 = vmatpush1.bf16.msra.mxu0 %v1548_v8  ;;  %619 = vmatpush1.bf16.msra.mxu1 %v1590_v15 }
 0x222   :  { %579 = vmatprep.subr.bf16.mxu0 %v1555_v9  ;;  %620 = vmatprep.subr.bf16.mxu1 %v1596_v16 }
 0x225   :  { %580 = vmatpush1.bf16.msra.mxu0 %v1573_v12  ;;  %621 = vmatpush1.bf16.msra.mxu1 %v1614_v19 }
 0x226   :  { %581 = vmatprep.subr.bf16.mxu0 %v1578_v13  ;;  %622 = vmatprep.subr.bf16.mxu1 %v1620_v20 }
 0x229   :  { %582 = vmatpush1.bf16.msra.mxu0 %v1602_v17  ;;  %623 = vmatpush1.bf16.msra.mxu1 %v1638_v23 }
 0x22a   :  { %583 = vmatprep.subr.bf16.mxu0 %v1608_v18  ;;  %624 = vmatprep.subr.bf16.mxu1 %v1644_v24 }
 0x22d   :  { %584 = vmatpush1.bf16.msra.mxu0 %v1626_v21  ;;  %625 = vmatpush1.bf16.msra.mxu1 %v1662_v27 }
 0x22e   :  { %585 = vmatprep.subr.bf16.mxu0 %v1631_v22  ;;  %626 = vmatprep.subr.bf16.mxu1 %v1668_v28 }
 0x231   :  { %586 = vmatpush1.bf16.msra.mxu0 %v1650_v25  ;;  %627 = vmatpush1.bf16.msra.mxu1 %v1681_v30 }
 0x232   :  { %587 = vmatprep.subr.bf16.mxu0 %v1656_v26  ;;  %628 = vmatprep.subr.bf16.mxu1 %v1687_v31 }
 0x235   :  { %588 = vmatpush1.bf16.msra.mxu0 %v1674_v29  ;;  %629 = vmatpush1.bf16.msra.mxu1 %v1694_v32 }
 0x236   :  { %691 = vmatprep.subr.bf16.mxu0 %v1507_v0  ;;  %732 = vmatprep.subr.bf16.mxu1 %v1537_v6 }
 0x2d8   :  { %v489_v43 = vpop.f32.mrf.mxu0  ;;  %v530_v44 = vpop.f32.mrf.mxu1 }
 0x2d9   :  { %v537_v46 = vadd.f32 %v1219_v33, %v489_v43  ;;  %v539_v61 = vadd.f32 %v1221_v58, %v530_v44 }
 0x2da   :  { %v491_v47 = vpop.f32.mrf.mxu0  ;;  %v532_v48 = vpop.f32.mrf.mxu1 }
 0x2db   :  { %v1223_v49 = vmul.f32 -1.442695, %v537_v46  ;;  %v538_v50 = vadd.f32 %v1220_v45, %v491_v47  ;;  %v540_v57 = vadd.f32 %v1222_v56, %v532_v48 }
 0x2dc   :  { %v493_v51 = vpop.f32.mrf.mxu0  ;;  %v534_v52 = vpop.f32.mrf.mxu1 }
 0x2dd   :  { %1349 = vpow2.f32 %v1223_v49  ;;  %v1224_v53 = vmul.f32 -1.442695, %v538_v50  ;;  %v1225_v59 = vmul.f32 -1.442695, %v540_v57  ;;  %v1228_v49 = vld [vmem:[%s2151_s0 + $0x68] sm:$0xff] }
 0x2de   :  { %v494_v54 = vpop.f32.mrf.mxu0  ;;  %v535_v55 = vpop.f32.mrf.mxu1 }
 0x2df   :  { %1351 = vpow2.f32 %v1224_v53 }
 0x2e0   :  { %1353 = vpow2.f32 %v1225_v59 }
 0x2ea   :  { %v1350_v60 = vpop.eup %1349 }
 0x2eb   :  { %v547_v62 = vadd.f32 1.0, %v1350_v60  ;;  %v1230_v60 = vld [vmem:[%s2151_s0 + $0x78] sm:$0xff] }
 0x2ec   :  { %v1352_v63 = vpop.eup %1351 }
 0x2ed   :  { %1355 = vrcp.f32 %v547_v62  ;;  %v548_v34 = vadd.f32 1.0, %v1352_v63  ;;  %v1354_v35 = vpop.eup %1353  ;;  %v1229_v62 = vld [vmem:[%s2151_s0 + $0x70] sm:$0xff] }
 0x2ee   :  { %1357 = vtanh.f32 %v539_v61  ;;  %v557_v40 = vadd.f32 1.0, %v1354_v35 }
 0x2ef   :  { %1359 = vrcp.f32 %v548_v34 }
 0x2f0   :  { %1361 = vrcp.f32 %v557_v40 }
 0x2fa   :  { %v1356_v36 = vpop.eup %1355 }
 0x2fb   :  { %v1358_v37 = vpop.eup %1357 }
 0x2fc   :  { %v1360_v39 = vpop.eup %1359  ;;  %v561_v41 = vmul.f32 %v1358_v37, %v1356_v36 }
 0x2fd   :  { %v560_v42 = vmul.f32 %v1360_v39, %v1799_v38  ;;  %v1362_v43 = vpop.eup %1361  ;;  %v1227_v38 = vld [vmem:[%s2151_s0 + $0x60] sm:$0xff] }
 0x2ff   :  { %v1852_v33 = vadd.f32 %v561_v41, %v560_v42 }
 0x301   :  { %1363 = vtanh.f32 %v1852_v33 }
 0x30e   :  { %v1364_v44 = vpop.eup %1363 }
 0x30f   :  { %v564_v45 = vmul.f32 %v1364_v44, %v1362_v43 }
 0x311   :  { %1226 = vst [vmem:[%s2152_s2 + $0x10] sm:$0xff] %v564_v45  ;;  %v572_v46 = vpack.c.bf16 %v564_v45, %v564_v45 }
 0x313   :  { %606 = vmatmul.mubr.bf16.vlgmr.msra.gmra.mxu0 %v572_v46  ;;  %647 = vmatmul.mubr.bf16.vlgmr.msra.gmra.mxu1 %v572_v46 }
 0x314   :  { %692 = vmatpush1.bf16.msra.mxu0 %v1514_v2  ;;  %733 = vmatpush1.bf16.msra.mxu1 %v1542_v7 }
 0x315   :  { %693 = vmatprep.subr.bf16.mxu0 %v1520_v3  ;;  %734 = vmatprep.subr.bf16.mxu1 %v1561_v10 }
 0x316   :  { %723 = vmatprep.mubr.bf16.mxu0 %v1477_v1  ;;  %764 = vmatprep.mubr.bf16.mxu1 %v1477_v1 }
 0x318   :  { %694 = vmatpush1.bf16.msra.mxu0 %v1526_v4  ;;  %735 = vmatpush1.bf16.msra.mxu1 %v1566_v11 }
 0x319   :  { %695 = vmatprep.subr.bf16.mxu0 %v1532_v5  ;;  %736 = vmatprep.subr.bf16.mxu1 %v1583_v14 }
 0x31c   :  { %696 = vmatpush1.bf16.msra.mxu0 %v1548_v8  ;;  %737 = vmatpush1.bf16.msra.mxu1 %v1590_v15 }
 0x31d   :  { %697 = vmatprep.subr.bf16.mxu0 %v1555_v9  ;;  %738 = vmatprep.subr.bf16.mxu1 %v1596_v16 }
 0x320   :  { %698 = vmatpush1.bf16.msra.mxu0 %v1573_v12  ;;  %739 = vmatpush1.bf16.msra.mxu1 %v1614_v19 }
 0x321   :  { %699 = vmatprep.subr.bf16.mxu0 %v1578_v13  ;;  %740 = vmatprep.subr.bf16.mxu1 %v1620_v20 }
 0x324   :  { %700 = vmatpush1.bf16.msra.mxu0 %v1602_v17  ;;  %741 = vmatpush1.bf16.msra.mxu1 %v1638_v23 }
 0x325   :  { %701 = vmatprep.subr.bf16.mxu0 %v1608_v18  ;;  %742 = vmatprep.subr.bf16.mxu1 %v1644_v24 }
 0x328   :  { %702 = vmatpush1.bf16.msra.mxu0 %v1626_v21  ;;  %743 = vmatpush1.bf16.msra.mxu1 %v1662_v27 }
 0x329   :  { %703 = vmatprep.subr.bf16.mxu0 %v1631_v22  ;;  %744 = vmatprep.subr.bf16.mxu1 %v1668_v28 }
 0x32c   :  { %704 = vmatpush1.bf16.msra.mxu0 %v1650_v25  ;;  %745 = vmatpush1.bf16.msra.mxu1 %v1681_v30 }
 0x32d   :  { %705 = vmatprep.subr.bf16.mxu0 %v1656_v26  ;;  %746 = vmatprep.subr.bf16.mxu1 %v1687_v31 }
 0x330   :  { %706 = vmatpush1.bf16.msra.mxu0 %v1674_v29  ;;  %747 = vmatpush1.bf16.msra.mxu1 %v1694_v32 }
 0x331   :  { %809 = vmatprep.subr.bf16.mxu0 %v1507_v0  ;;  %850 = vmatprep.subr.bf16.mxu1 %v1537_v6 }
 0x3d3   :  { %v607_v47 = vpop.f32.mrf.mxu0  ;;  %v648_v48 = vpop.f32.mrf.mxu1 }
 0x3d4   :  { %v655_v50 = vadd.f32 %v1227_v38, %v607_v47  ;;  %v657_v35 = vadd.f32 %v1229_v62, %v648_v48  ;;  %v1238_v62 = vld [vmem:[%s2151_s0 + $0x98] sm:$0xff] }
 0x3d5   :  { %v609_v51 = vpop.f32.mrf.mxu0  ;;  %v650_v52 = vpop.f32.mrf.mxu1 }
 0x3d6   :  { %v1231_v53 = vmul.f32 -1.442695, %v655_v50  ;;  %v656_v54 = vadd.f32 %v1228_v49, %v609_v51  ;;  %v658_v61 = vadd.f32 %v1230_v60, %v650_v52 }
 0x3d7   :  { %v611_v55 = vpop.f32.mrf.mxu0  ;;  %v652_v56 = vpop.f32.mrf.mxu1 }
 0x3d8   :  { %1365 = vpow2.f32 %v1231_v53  ;;  %v1232_v57 = vmul.f32 -1.442695, %v656_v54  ;;  %v1233_v63 = vmul.f32 -1.442695, %v658_v61  ;;  %v1236_v53 = vld [vmem:[%s2151_s0 + $0x88] sm:$0xff] }
 0x3d9   :  { %v612_v58 = vpop.f32.mrf.mxu0  ;;  %v653_v59 = vpop.f32.mrf.mxu1 }
 0x3da   :  { %1367 = vpow2.f32 %v1232_v57 }
 0x3db   :  { %1369 = vpow2.f32 %v1233_v63 }
 0x3e5   :  { %v1366_v34 = vpop.eup %1365 }
 0x3e6   :  { %v665_v36 = vadd.f32 1.0, %v1366_v34  ;;  %v1237_v34 = vld [vmem:[%s2151_s0 + $0x90] sm:$0xff] }
 0x3e7   :  { %v1368_v37 = vpop.eup %1367 }
 0x3e8   :  { %1371 = vrcp.f32 %v665_v36  ;;  %v666_v39 = vadd.f32 1.0, %v1368_v37  ;;  %v1370_v40 = vpop.eup %1369 }
 0x3e9   :  { %1373 = vtanh.f32 %v657_v35  ;;  %v675_v44 = vadd.f32 1.0, %v1370_v40 }
 0x3ea   :  { %1375 = vrcp.f32 %v666_v39 }
 0x3eb   :  { %1377 = vrcp.f32 %v675_v44 }
 0x3f5   :  { %v1372_v41 = vpop.eup %1371 }
 0x3f6   :  { %v1374_v42 = vpop.eup %1373 }
 0x3f7   :  { %v1376_v43 = vpop.eup %1375  ;;  %v679_v45 = vmul.f32 %v1374_v42, %v1372_v41 }
 0x3f8   :  { %v678_v46 = vmul.f32 %v1376_v43, %v1852_v33  ;;  %v1378_v47 = vpop.eup %1377  ;;  %v1235_v33 = vld [vmem:[%s2151_s0 + $0x80] sm:$0xff] }
 0x3fa   :  { %v1905_v38 = vadd.f32 %v679_v45, %v678_v46 }
 0x3fc   :  { %1379 = vtanh.f32 %v1905_v38 }
 0x409   :  { %v1380_v48 = vpop.eup %1379 }
 0x40a   :  { %v682_v49 = vmul.f32 %v1380_v48, %v1378_v47 }
 0x40c   :  { %1234 = vst [vmem:[%s2152_s2 + $0x18] sm:$0xff] %v682_v49  ;;  %v690_v50 = vpack.c.bf16 %v682_v49, %v682_v49 }
 0x40e   :  { %724 = vmatmul.mubr.bf16.vlgmr.msra.gmra.mxu0 %v690_v50  ;;  %765 = vmatmul.mubr.bf16.vlgmr.msra.gmra.mxu1 %v690_v50 }
 0x40f   :  { %810 = vmatpush1.bf16.msra.mxu0 %v1514_v2  ;;  %851 = vmatpush1.bf16.msra.mxu1 %v1542_v7 }
 0x410   :  { %811 = vmatprep.subr.bf16.mxu0 %v1520_v3  ;;  %852 = vmatprep.subr.bf16.mxu1 %v1561_v10 }
 0x411   :  { %841 = vmatprep.mubr.bf16.mxu0 %v1477_v1  ;;  %882 = vmatprep.mubr.bf16.mxu1 %v1477_v1 }
 0x413   :  { %812 = vmatpush1.bf16.msra.mxu0 %v1526_v4  ;;  %853 = vmatpush1.bf16.msra.mxu1 %v1566_v11 }
 0x414   :  { %813 = vmatprep.subr.bf16.mxu0 %v1532_v5  ;;  %854 = vmatprep.subr.bf16.mxu1 %v1583_v14 }
 0x417   :  { %814 = vmatpush1.bf16.msra.mxu0 %v1548_v8  ;;  %855 = vmatpush1.bf16.msra.mxu1 %v1590_v15 }
 0x418   :  { %815 = vmatprep.subr.bf16.mxu0 %v1555_v9  ;;  %856 = vmatprep.subr.bf16.mxu1 %v1596_v16 }
 0x41b   :  { %816 = vmatpush1.bf16.msra.mxu0 %v1573_v12  ;;  %857 = vmatpush1.bf16.msra.mxu1 %v1614_v19 }
 0x41c   :  { %817 = vmatprep.subr.bf16.mxu0 %v1578_v13  ;;  %858 = vmatprep.subr.bf16.mxu1 %v1620_v20 }
 0x41f   :  { %818 = vmatpush1.bf16.msra.mxu0 %v1602_v17  ;;  %859 = vmatpush1.bf16.msra.mxu1 %v1638_v23 }
 0x420   :  { %819 = vmatprep.subr.bf16.mxu0 %v1608_v18  ;;  %860 = vmatprep.subr.bf16.mxu1 %v1644_v24 }
 0x423   :  { %820 = vmatpush1.bf16.msra.mxu0 %v1626_v21  ;;  %861 = vmatpush1.bf16.msra.mxu1 %v1662_v27 }
 0x424   :  { %821 = vmatprep.subr.bf16.mxu0 %v1631_v22  ;;  %862 = vmatprep.subr.bf16.mxu1 %v1668_v28 }
 0x427   :  { %822 = vmatpush1.bf16.msra.mxu0 %v1650_v25  ;;  %863 = vmatpush1.bf16.msra.mxu1 %v1681_v30 }
 0x428   :  { %823 = vmatprep.subr.bf16.mxu0 %v1656_v26  ;;  %864 = vmatprep.subr.bf16.mxu1 %v1687_v31 }
 0x42b   :  { %824 = vmatpush1.bf16.msra.mxu0 %v1674_v29  ;;  %865 = vmatpush1.bf16.msra.mxu1 %v1694_v32 }
 0x42c   :  { %927 = vmatprep.subr.bf16.mxu0 %v1507_v0  ;;  %968 = vmatprep.subr.bf16.mxu1 %v1537_v6 }
 0x4ce   :  { %v725_v51 = vpop.f32.mrf.mxu0  ;;  %v766_v52 = vpop.f32.mrf.mxu1 }
 0x4cf   :  { %v773_v54 = vadd.f32 %v1235_v33, %v725_v51  ;;  %v775_v37 = vadd.f32 %v1237_v34, %v766_v52  ;;  %v1454_v34 = vld [vmem:[%s2150_s1 + $0xac] ss:$16 sps:$4 sm:$0xff]  }
 0x4d0   :  { %v727_v55 = vpop.f32.mrf.mxu0  ;;  %v768_v56 = vpop.f32.mrf.mxu1 }
 0x4d1   :  { %v1239_v57 = vmul.f32 -1.442695, %v773_v54  ;;  %v774_v58 = vadd.f32 %v1236_v53, %v727_v55  ;;  %v776_v63 = vadd.f32 %v1238_v62, %v768_v56  ;;  %v1452_v62 = vld [vmem:[%s2150_s1 + $0xc8] ss:$16 sps:$4 sm:$0xff]  }
 0x4d2   :  { %v729_v59 = vpop.f32.mrf.mxu0  ;;  %v770_v60 = vpop.f32.mrf.mxu1 }
 0x4d3   :  { %1381 = vpow2.f32 %v1239_v57  ;;  %v1240_v0 = vmul.f32 -1.442695, %v774_v58  ;;  %v1241_v35 = vmul.f32 -1.442695, %v776_v63  ;;  %v1447_v59 = vld [vmem:[%s2150_s1 + $0xe0] ss:$16 sps:$4 sm:$0xff]  }
 0x4d4   :  { %v730_v6 = vpop.f32.mrf.mxu0  ;;  %v771_v61 = vpop.f32.mrf.mxu1  ;;  %v1448_v60 = vld [vmem:[%s2150_s1 + $0xe8] ss:$16 sps:$4 sm:$0xff]   ;;  %v1453_v63 = vld [vmem:[%s2150_s1 + $0xa4] ss:$16 sps:$4 sm:$0xff]  }
 0x4d5   :  { %1383 = vpow2.f32 %v1240_v0  ;;  %v1449_v0 = vld [vmem:[%s2150_s1 + $0xc4] ss:$16 sps:$4 sm:$0xff]   ;;  %v1450_v6 = vld [vmem:[%s2150_s1 + $0xcc] ss:$16 sps:$4 sm:$0xff]   ;;  %v1451_v61 = vld [vmem:[%s2150_s1 + $0xc0] ss:$16 sps:$4 sm:$0xff]  }
 0x4d6   :  { %1385 = vpow2.f32 %v1241_v35  ;;  %v1456_v35 = vld [vmem:[%s2150_s1 + $0xa8] ss:$16 sps:$4 sm:$0xff]  }
 0x4e0   :  { %v1382_v36 = vpop.eup %1381 }
 0x4e1   :  { %v783_v39 = vadd.f32 1.0, %v1382_v36  ;;  %v1457_v36 = vld [vmem:[%s2150_s1 + $0x84] ss:$16 sps:$4 sm:$0xff]  }
 0x4e2   :  { %v1384_v40 = vpop.eup %1383 }
 0x4e3   :  { %1387 = vrcp.f32 %v783_v39  ;;  %v784_v41 = vadd.f32 1.0, %v1384_v40  ;;  %v1386_v42 = vpop.eup %1385  ;;  %v1459_v39 = vld [vmem:[%s2150_s1 + $0x80] ss:$16 sps:$4 sm:$0xff]   ;;  %v1460_v40 = vld [vmem:[%s2150_s1 + $0x88] ss:$16 sps:$4 sm:$0xff]  }
 0x4e4   :  { %1389 = vtanh.f32 %v775_v37  ;;  %v793_v46 = vadd.f32 1.0, %v1386_v42  ;;  %v1458_v37 = vld [vmem:[%s2150_s1 + $0x8c] ss:$16 sps:$4 sm:$0xff]  }
 0x4e5   :  { %1391 = vrcp.f32 %v784_v41  ;;  %v1461_v41 = vld [vmem:[%s2150_s1 + $0x64] ss:$16 sps:$4 sm:$0xff]   ;;  %v1462_v42 = vld [vmem:[%s2150_s1 + $0x6c] ss:$16 sps:$4 sm:$0xff]  }
 0x4e6   :  { %1393 = vrcp.f32 %v793_v46  ;;  %v1466_v46 = vld [vmem:[%s2150_s1 + $0x4c] ss:$16 sps:$4 sm:$0xff]  }
 0x4f0   :  { %v1388_v43 = vpop.eup %1387 }
 0x4f1   :  { %v1390_v44 = vpop.eup %1389 }
 0x4f2   :  { %v1392_v45 = vpop.eup %1391  ;;  %v797_v47 = vmul.f32 %v1390_v44, %v1388_v43  ;;  %v1463_v43 = vld [vmem:[%s2150_s1 + $0x60] ss:$16 sps:$4 sm:$0xff]   ;;  %v1464_v44 = vld [vmem:[%s2150_s1 + $0x68] ss:$16 sps:$4 sm:$0xff]  }
 0x4f3   :  { %v796_v48 = vmul.f32 %v1392_v45, %v1905_v38  ;;  %v1394_v50 = vpop.eup %1393  ;;  %v1465_v45 = vld [vmem:[%s2150_s1 + $0x44] ss:$16 sps:$4 sm:$0xff]  }
 0x4f5   :  { %v1958_v49 = vadd.f32 %v797_v47, %v796_v48  ;;  %v1467_v47 = vld [vmem:[%s2150_s1 + $0x40] ss:$16 sps:$4 sm:$0xff]   ;;  %v1468_v48 = vld [vmem:[%s2150_s1 + $0x48] ss:$16 sps:$4 sm:$0xff]  }
 0x4f7   :  { %1395 = vtanh.f32 %v1958_v49 }
 0x504   :  { %v1396_v33 = vpop.eup %1395 }
 0x505   :  { %v800_v51 = vmul.f32 %v1396_v33, %v1394_v50  ;;  %v1470_v50 = vld [vmem:[%s2150_s1 + $0x2c] ss:$16 sps:$4 sm:$0xff]   ;;  %v1471_v33 = vld [vmem:[%s2150_s1 + $0x20] ss:$16 sps:$4 sm:$0xff]  }
 0x507   :  { %1242 = vst [vmem:[%s2152_s2 + $0x20] sm:$0xff] %v800_v51  ;;  %v808_v52 = vpack.c.bf16 %v800_v51, %v800_v51  ;;  %v1472_v51 = vld [vmem:[%s2150_s1 + $0x28] ss:$16 sps:$4 sm:$0xff]  }
 0x509   :  { %842 = vmatmul.mubr.bf16.vlgmr.msra.gmra.mxu0 %v808_v52  ;;  %883 = vmatmul.mubr.bf16.vlgmr.msra.gmra.mxu1 %v808_v52  ;;  %v1473_v52 = vld [vmem:[%s2150_s1 + $0x4] ss:$16 sps:$4 sm:$0xff]  }
 0x50a   :  { %928 = vmatpush1.bf16.msra.mxu0 %v1514_v2  ;;  %969 = vmatpush1.bf16.msra.mxu1 %v1542_v7  ;;  %v1445_v2 = vld [vmem:[%s2150_s1 + $0xe4] ss:$16 sps:$4 sm:$0xff]  }
 0x50b   :  { %929 = vmatprep.subr.bf16.mxu0 %v1520_v3  ;;  %970 = vmatprep.subr.bf16.mxu1 %v1561_v10  ;;  %v1446_v3 = vld [vmem:[%s2150_s1 + $0xec] ss:$16 sps:$4 sm:$0xff]  }
 0x50c   :  { %959 = vmatprep.mubr.bf16.mxu0 %v1477_v1  ;;  %1000 = vmatprep.mubr.bf16.mxu1 %v1477_v1 }
 0x50e   :  { %930 = vmatpush1.bf16.msra.mxu0 %v1526_v4  ;;  %971 = vmatpush1.bf16.msra.mxu1 %v1566_v11  ;;  %v1243_v4 = vld [vmem:[%s2151_s0 + $0xa0] sm:$0xff] }
 0x50f   :  { %931 = vmatprep.subr.bf16.mxu0 %v1532_v5  ;;  %972 = vmatprep.subr.bf16.mxu1 %v1583_v14 }
 0x512   :  { %932 = vmatpush1.bf16.msra.mxu0 %v1548_v8  ;;  %973 = vmatpush1.bf16.msra.mxu1 %v1590_v15  ;;  %v1244_v8 = vld [vmem:[%s2151_s0 + $0xa8] sm:$0xff] }
 0x513   :  { %933 = vmatprep.subr.bf16.mxu0 %v1555_v9  ;;  %974 = vmatprep.subr.bf16.mxu1 %v1596_v16 }
 0x516   :  { %934 = vmatpush1.bf16.msra.mxu0 %v1573_v12  ;;  %975 = vmatpush1.bf16.msra.mxu1 %v1614_v19  ;;  %v1246_v19 = vld [vmem:[%s2151_s0 + $0xb8] sm:$0xff] }
 0x517   :  { %935 = vmatprep.subr.bf16.mxu0 %v1578_v13  ;;  %976 = vmatprep.subr.bf16.mxu1 %v1620_v20 }
 0x51a   :  { %936 = vmatpush1.bf16.msra.mxu0 %v1602_v17  ;;  %977 = vmatpush1.bf16.msra.mxu1 %v1638_v23 }
 0x51b   :  { %937 = vmatprep.subr.bf16.mxu0 %v1608_v18  ;;  %978 = vmatprep.subr.bf16.mxu1 %v1644_v24 }
 0x51e   :  { %938 = vmatpush1.bf16.msra.mxu0 %v1626_v21  ;;  %979 = vmatpush1.bf16.msra.mxu1 %v1662_v27  ;;  %v1245_v21 = vld [vmem:[%s2151_s0 + $0xb0] sm:$0xff] }
 0x51f   :  { %939 = vmatprep.subr.bf16.mxu0 %v1631_v22  ;;  %980 = vmatprep.subr.bf16.mxu1 %v1668_v28 }
 0x522   :  { %940 = vmatpush1.bf16.msra.mxu0 %v1650_v25  ;;  %981 = vmatpush1.bf16.msra.mxu1 %v1681_v30 }
 0x523   :  { %941 = vmatprep.subr.bf16.mxu0 %v1656_v26  ;;  %982 = vmatprep.subr.bf16.mxu1 %v1687_v31 }
 0x526   :  { %942 = vmatpush1.bf16.msra.mxu0 %v1674_v29  ;;  %983 = vmatpush1.bf16.msra.mxu1 %v1694_v32 }
 0x527   :  { %1045 = vmatprep.subr.bf16.mxu0 %v1445_v2  ;;  %1086 = vmatprep.subr.bf16.mxu1 %v1446_v3  ;;  %v1474_v2 = vld [vmem:[%s2150_s1 + $0xc] ss:$16 sps:$4 sm:$0xff]   ;;  %v1475_v3 = vld [vmem:[%s2150_s1] ss:$16 sps:$4 sm:$0xff]  }
 0x5c9   :  { %v843_v5 = vpop.f32.mrf.mxu0  ;;  %v884_v7 = vpop.f32.mrf.mxu1 }
 0x5ca   :  { %v891_v9 = vadd.f32 %v1243_v4, %v843_v5  ;;  %v893_v24 = vadd.f32 %v1245_v21, %v884_v7  ;;  %v1476_v4 = vld [vmem:[%s2150_s1 + $0x8] ss:$16 sps:$4 sm:$0xff]   ;;  %v1251_v5 = vld [vmem:[%s2151_s0 + $0xc0] sm:$0xff] }
 0x5cb   :  { %v845_v10 = vpop.f32.mrf.mxu0  ;;  %v886_v11 = vpop.f32.mrf.mxu1 }
 0x5cc   :  { %v1247_v12 = vmul.f32 -1.442695, %v891_v9  ;;  %v892_v13 = vadd.f32 %v1244_v8, %v845_v10  ;;  %v894_v20 = vadd.f32 %v1246_v19, %v886_v11  ;;  %v1252_v9 = vld [vmem:[%s2151_s0 + $0xc8] sm:$0xff] }
 0x5cd   :  { %v847_v14 = vpop.f32.mrf.mxu0  ;;  %v888_v15 = vpop.f32.mrf.mxu1 }
 0x5ce   :  { %1397 = vpow2.f32 %v1247_v12  ;;  %v1248_v16 = vmul.f32 -1.442695, %v892_v13  ;;  %v1249_v22 = vmul.f32 -1.442695, %v894_v20  ;;  %v1254_v20 = vld [vmem:[%s2151_s0 + $0xd8] sm:$0xff] }
 0x5cf   :  { %v848_v17 = vpop.f32.mrf.mxu0  ;;  %v889_v18 = vpop.f32.mrf.mxu1 }
 0x5d0   :  { %1399 = vpow2.f32 %v1248_v16 }
 0x5d1   :  { %1401 = vpow2.f32 %v1249_v22  ;;  %v1253_v22 = vld [vmem:[%s2151_s0 + $0xd0] sm:$0xff] }
 0x5db   :  { %v1398_v23 = vpop.eup %1397 }
 0x5dc   :  { %v901_v25 = vadd.f32 1.0, %v1398_v23 }
 0x5dd   :  { %v1400_v26 = vpop.eup %1399 }
 0x5de   :  { %1403 = vrcp.f32 %v901_v25  ;;  %v902_v27 = vadd.f32 1.0, %v1400_v26  ;;  %v1402_v28 = vpop.eup %1401 }
 0x5df   :  { %1405 = vtanh.f32 %v893_v24  ;;  %v911_v32 = vadd.f32 1.0, %v1402_v28 }
 0x5e0   :  { %1407 = vrcp.f32 %v902_v27 }
 0x5e1   :  { %1409 = vrcp.f32 %v911_v32 }
 0x5eb   :  { %v1404_v29 = vpop.eup %1403 }
 0x5ec   :  { %v1406_v30 = vpop.eup %1405 }
 0x5ed   :  { %v1408_v31 = vpop.eup %1407  ;;  %v915_v38 = vmul.f32 %v1406_v30, %v1404_v29 }
 0x5ee   :  { %v914_v53 = vmul.f32 %v1408_v31, %v1958_v49  ;;  %v1410_v55 = vpop.eup %1409  ;;  %v1469_v49 = vld [vmem:[%s2150_s1 + $0x24] ss:$16 sps:$4 sm:$0xff]  }
 0x5f0   :  { %v2015_v54 = vadd.f32 %v915_v38, %v914_v53 }
 0x5f2   :  { %1411 = vtanh.f32 %v2015_v54 }
 0x5ff   :  { %v1412_v56 = vpop.eup %1411 }
 0x600   :  { %v918_v57 = vmul.f32 %v1412_v56, %v1410_v55 }
 0x602   :  { %1250 = vst [vmem:[%s2152_s2 + $0x28] sm:$0xff] %v918_v57  ;;  %v926_v58 = vpack.c.bf16 %v918_v57, %v918_v57 }
 0x604   :  { %960 = vmatmul.mubr.bf16.vlgmr.msra.gmra.mxu0 %v926_v58  ;;  %1001 = vmatmul.mubr.bf16.vlgmr.msra.gmra.mxu1 %v926_v58 }
 0x605   :  { %1046 = vmatpush1.bf16.msra.mxu0 %v1447_v59  ;;  %1087 = vmatpush1.bf16.msra.mxu1 %v1448_v60 }
 0x606   :  { %1047 = vmatprep.subr.bf16.mxu0 %v1449_v0  ;;  %1088 = vmatprep.subr.bf16.mxu1 %v1450_v6  ;;  %v1259_v0 = vld [vmem:[%s2151_s0 + $0xe0] sm:$0xff] }
 0x607   :  { %1077 = vmatprep.mubr.bf16.mxu0 %v1477_v1  ;;  %1118 = vmatprep.mubr.bf16.mxu1 %v1477_v1  ;;  %v1455_v1 = vld [vmem:[%s2150_s1 + $0xa0] ss:$16 sps:$4 sm:$0xff]  }
 0x609   :  { %1048 = vmatpush1.bf16.msra.mxu0 %v1451_v61  ;;  %1089 = vmatpush1.bf16.msra.mxu1 %v1452_v62 }
 0x60a   :  { %1049 = vmatprep.subr.bf16.mxu0 %v1453_v63  ;;  %1090 = vmatprep.subr.bf16.mxu1 %v1454_v34 }
 0x60d   :  { %1050 = vmatpush1.bf16.msra.mxu0 %v1455_v1  ;;  %1091 = vmatpush1.bf16.msra.mxu1 %v1456_v35 }
 0x60e   :  { %1051 = vmatprep.subr.bf16.mxu0 %v1457_v36  ;;  %1092 = vmatprep.subr.bf16.mxu1 %v1458_v37 }
 0x611   :  { %1052 = vmatpush1.bf16.msra.mxu0 %v1459_v39  ;;  %1093 = vmatpush1.bf16.msra.mxu1 %v1460_v40 }
 0x612   :  { %1053 = vmatprep.subr.bf16.mxu0 %v1461_v41  ;;  %1094 = vmatprep.subr.bf16.mxu1 %v1462_v42  ;;  %v1262_v42 = vld [vmem:[%s2151_s0 + $0xf8] sm:$0xff] }
 0x615   :  { %1054 = vmatpush1.bf16.msra.mxu0 %v1463_v43  ;;  %1095 = vmatpush1.bf16.msra.mxu1 %v1464_v44  ;;  %v1261_v44 = vld [vmem:[%s2151_s0 + $0xf0] sm:$0xff] }
 0x616   :  { %1055 = vmatprep.subr.bf16.mxu0 %v1465_v45  ;;  %1096 = vmatprep.subr.bf16.mxu1 %v1466_v46 }
 0x619   :  { %1056 = vmatpush1.bf16.msra.mxu0 %v1467_v47  ;;  %1097 = vmatpush1.bf16.msra.mxu1 %v1468_v48 }
 0x61a   :  { %1057 = vmatprep.subr.bf16.mxu0 %v1469_v49  ;;  %1098 = vmatprep.subr.bf16.mxu1 %v1470_v50 }
 0x61d   :  { %1058 = vmatpush1.bf16.msra.mxu0 %v1471_v33  ;;  %1099 = vmatpush1.bf16.msra.mxu1 %v1472_v51 }
 0x61e   :  { %1059 = vmatprep.subr.bf16.mxu0 %v1473_v52  ;;  %1100 = vmatprep.subr.bf16.mxu1 %v1474_v2 }
 0x621   :  { %1060 = vmatpush1.bf16.msra.mxu0 %v1475_v3  ;;  %1101 = vmatpush1.bf16.msra.mxu1 %v1476_v4 }
 0x6c4   :  { %v961_v7 = vpop.f32.mrf.mxu0  ;;  %v1002_v8 = vpop.f32.mrf.mxu1 }
 0x6c5   :  { %v1009_v10 = vadd.f32 %v1251_v5, %v961_v7  ;;  %v1011_v25 = vadd.f32 %v1253_v22, %v1002_v8 }
 0x6c6   :  { %v963_v11 = vpop.f32.mrf.mxu0  ;;  %v1004_v12 = vpop.f32.mrf.mxu1 }
 0x6c7   :  { %v1255_v13 = vmul.f32 -1.442695, %v1009_v10  ;;  %v1010_v14 = vadd.f32 %v1252_v9, %v963_v11  ;;  %v1012_v21 = vadd.f32 %v1254_v20, %v1004_v12 }
 0x6c8   :  { %v965_v15 = vpop.f32.mrf.mxu0  ;;  %v1006_v16 = vpop.f32.mrf.mxu1 }
 0x6c9   :  { %1413 = vpow2.f32 %v1255_v13  ;;  %v1256_v17 = vmul.f32 -1.442695, %v1010_v14  ;;  %v1257_v23 = vmul.f32 -1.442695, %v1012_v21 }
 0x6ca   :  { %v966_v18 = vpop.f32.mrf.mxu0  ;;  %v1007_v19 = vpop.f32.mrf.mxu1 }
 0x6cb   :  { %1415 = vpow2.f32 %v1256_v17 }
 0x6cc   :  { %1417 = vpow2.f32 %v1257_v23 }
 0x6d6   :  { %v1414_v24 = vpop.eup %1413 }
 0x6d7   :  { %v1019_v26 = vadd.f32 1.0, %v1414_v24 }
 0x6d8   :  { %v1416_v27 = vpop.eup %1415 }
 0x6d9   :  { %1419 = vrcp.f32 %v1019_v26  ;;  %v1020_v28 = vadd.f32 1.0, %v1416_v27  ;;  %v1418_v29 = vpop.eup %1417 }
 0x6da   :  { %1421 = vtanh.f32 %v1011_v25  ;;  %v1029_v38 = vadd.f32 1.0, %v1418_v29 }
 0x6db   :  { %1423 = vrcp.f32 %v1020_v28 }
 0x6dc   :  { %1425 = vrcp.f32 %v1029_v38 }
 0x6e6   :  { %v1420_v30 = vpop.eup %1419 }
 0x6e7   :  { %v1422_v31 = vpop.eup %1421 }
 0x6e8   :  { %v1424_v32 = vpop.eup %1423  ;;  %v1033_v53 = vmul.f32 %v1422_v31, %v1420_v30 }
 0x6e9   :  { %v1032_v55 = vmul.f32 %v1424_v32, %v2015_v54  ;;  %v1426_v57 = vpop.eup %1425  ;;  %v1260_v54 = vld [vmem:[%s2151_s0 + $0xe8] sm:$0xff] }
 0x6eb   :  { %v1034_v56 = vadd.f32 %v1033_v53, %v1032_v55 }
 0x6ed   :  { %1427 = vtanh.f32 %v1034_v56 }
 0x6fa   :  { %v1428_v58 = vpop.eup %1427 }
 0x6fb   :  { %v1036_v59 = vmul.f32 %v1428_v58, %v1426_v57 }
 0x6fd   :  { %1258 = vst [vmem:[%s2152_s2 + $0x30] sm:$0xff] %v1036_v59  ;;  %v1044_v60 = vpack.c.bf16 %v1036_v59, %v1036_v59 }
 0x6ff   :  { %1078 = vmatmul.mubr.bf16.vlgmr.msra.gmra.mxu0 %v1044_v60  ;;  %1119 = vmatmul.mubr.bf16.vlgmr.msra.gmra.mxu1 %v1044_v60 }
 0x7bf   :  { %v1079_v6 = vpop.f32.mrf.mxu0  ;;  %v1120_v61 = vpop.f32.mrf.mxu1 }
 0x7c0   :  { %v1127_v62 = vadd.f32 %v1259_v0, %v1079_v6  ;;  %v1129_v47 = vadd.f32 %v1261_v44, %v1120_v61 }
 0x7c1   :  { %v1081_v63 = vpop.f32.mrf.mxu0  ;;  %v1122_v34 = vpop.f32.mrf.mxu1 }
 0x7c2   :  { %v1263_v1 = vmul.f32 -1.442695, %v1127_v62  ;;  %v1128_v35 = vadd.f32 %v1260_v54, %v1081_v63  ;;  %v1130_v43 = vadd.f32 %v1262_v42, %v1122_v34 }
 0x7c3   :  { %v1083_v36 = vpop.f32.mrf.mxu0  ;;  %v1124_v37 = vpop.f32.mrf.mxu1 }
 0x7c4   :  { %1429 = vpow2.f32 %v1263_v1  ;;  %v1264_v39 = vmul.f32 -1.442695, %v1128_v35  ;;  %v1265_v45 = vmul.f32 -1.442695, %v1130_v43 }
 0x7c5   :  { %v1084_v40 = vpop.f32.mrf.mxu0  ;;  %v1125_v41 = vpop.f32.mrf.mxu1 }
 0x7c6   :  { %1431 = vpow2.f32 %v1264_v39 }
 0x7c7   :  { %1433 = vpow2.f32 %v1265_v45 }
 0x7d1   :  { %v1430_v46 = vpop.eup %1429 }
 0x7d2   :  { %v1137_v48 = vadd.f32 1.0, %v1430_v46 }
 0x7d3   :  { %v1432_v49 = vpop.eup %1431 }
 0x7d4   :  { %1435 = vrcp.f32 %v1137_v48  ;;  %v1138_v50 = vadd.f32 1.0, %v1432_v49  ;;  %v1434_v33 = vpop.eup %1433 }
 0x7d5   :  { %1437 = vtanh.f32 %v1129_v47  ;;  %v1147_v3 = vadd.f32 1.0, %v1434_v33 }
 0x7d6   :  { %1439 = vrcp.f32 %v1138_v50 }
 0x7d7   :  { %1441 = vrcp.f32 %v1147_v3 }
 0x7e1   :  { %v1436_v51 = vpop.eup %1435 }
 0x7e2   :  { %v1438_v52 = vpop.eup %1437 }
 0x7e3   :  { %v1440_v2 = vpop.eup %1439  ;;  %v1151_v4 = vmul.f32 %v1438_v52, %v1436_v51 }
 0x7e4   :  { %v1150_v5 = vmul.f32 %v1440_v2, %v1034_v56  ;;  %v1442_v8 = vpop.eup %1441 }
 0x7e6   :  { %v1152_v7 = vadd.f32 %v1151_v4, %v1150_v5 }
 0x7e8   :  { %1443 = vtanh.f32 %v1152_v7  ;;  %1163 = vst [vmem:[%s2153_s4] sm:$0xff] %v1152_v7 }
 0x7f5   :  { %v1444_v9 = vpop.eup %1443 }
 0x7f6   :  { %v1154_v10 = vmul.f32 %v1444_v9, %v1442_v8 }
 0x7f8   :  { %1266 = vst [vmem:[%s2152_s2 + $0x38] sm:$0xff] %v1154_v10  ;;  %1162 = vst [vmem:[%s2154_s3] sm:$0xff] %v1154_v10 }

</bundles_post_ra>
